<compile_context>
chip_gen: v7x
topology: tpu7x:2x2x1
jax: 0.10.0
libtpu: 0.0.40
codegen_flags: <defaults>
</compile_context>

<pallas_src>
import functools
import math

import jax
import jax.numpy as jnp
from jax.experimental import pallas as pl
from jax.experimental.pallas import tpu as pltpu


def _round_up(x, m):
    return ((x + m - 1) // m) * m


def _vmem_tile_bytes(shape, itemsize):
    """Approximate padded VMEM footprint of one buffer ((8,128)-tiled)."""
    s = list(shape)
    if len(s) == 1:
        s = [1] + s
    s[-1] = _round_up(s[-1], 128)
    s[-2] = _round_up(s[-2], 8)
    n = 1
    for d in s:
        n *= d
    return n * itemsize


def _hw_config():
    """(mxu_native_m, vmem_budget_bytes, tensorcores_per_chip) by generation."""
    kind = ""
    try:
        kind = jax.devices()[0].device_kind.lower()
    except Exception:
        pass
    if "v5" in kind:
        return 128, 100 * 2**20, 1      # 4x128x128 MXU, 128 MiB VMEM
    if "v6" in kind:
        return 256, 100 * 2**20, 1      # 2x256x256 MXU, 128 MiB VMEM
    if "v7" in kind:
        return 256, 48 * 2**20, 2       # 64 MiB VMEM, 2 TCs -> want >=2 tiles
    return 128, 48 * 2**20, 1           # unknown: conservative


# ----------------------------------------------------------------------------
# Pallas kernel
# ----------------------------------------------------------------------------
def _costnet_kernel(
    x_ref,        # [1, n_hist*BT, Fin]      bf16  encoder-linear input (one batch tile)
    we_ref,       # [Fin, H]                 bf16  encoder_linear weight (transposed)
    be_ref,       # [1, H]                   f32   encoder_linear bias
    wih_e_ref,    # [L, H, 4H]               bf16  encoder LSTM input->gate weights
    whh_e_ref,    # [L, H, 4H]               bf16  encoder LSTM hidden->gate weights
    b_e_ref,      # [L, 1, 4H]               f32   encoder LSTM bias (b_ih + b_hh folded)
    wih_d_ref,    # [L, H, 4H]               bf16  decoder LSTM input->gate weights
    whh_d_ref,    # [L, H, 4H]               bf16  decoder LSTM hidden->gate weights
    b_d_ref,      # [L, 1, 4H]               f32   decoder LSTM bias
    wd_ref,       # [H, Fout_pad]            bf16  decoder_linear weight (lane-padded)
    bd_ref,       # [1, Fout_pad]            f32   decoder_linear bias (lane-padded)
    out_ref,      # [1, n_pred*BT, Fout_pad] f32
    enc_buf,      # scratch [n_hist*BT, H]   f32
    g0_buf,       # scratch [n_hist*BT, 4H]  f32
    dec_buf,      # scratch [n_pred*BT, H]   f32
    *,
    n_hist, n_pred, BT, L, H,
):
    f32, bf16 = jnp.float32, jnp.bfloat16

    # ---- encoder linear over ALL timesteps: one batched MXU matmul ----------
    enc_buf[...] = (
        jnp.dot(x_ref[0], we_ref[...], preferred_element_type=f32) + be_ref[...]
    )

    # ---- cuDNN-style split: encoder layer-0 input-gate contribution (+bias)
    #      for all timesteps as ONE large, fully-parallel matmul.
    g0_buf[...] = (
        jnp.dot(enc_buf[...].astype(bf16), wih_e_ref[0],
                preferred_element_type=f32)
        + b_e_ref[0]
    )

    def gate_act(gates, c):
        # full-width sigmoid (one EUP pass over [BT,4H]); tanh only on g slice
        sig = jax.nn.sigmoid(gates)
        i = sig[:, 0 * H:1 * H]
        f = sig[:, 1 * H:2 * H]
        o = sig[:, 3 * H:4 * H]
        g = jnp.tanh(gates[:, 2 * H:3 * H])
        c_new = f * c + i * g
        h_new = o * jnp.tanh(c_new)
        return h_new, c_new

    def cell(x, h, c, w_ih, w_hh, b):
        # two MXU pushes instead of materializing concat([x, h]) every step
        gates = (
            jnp.dot(x.astype(bf16), w_ih, preferred_element_type=f32)
            + jnp.dot(h.astype(bf16), w_hh, preferred_element_type=f32)
            + b
        )
        return gate_act(gates, c)

    zeros = jnp.zeros((BT, H), f32)
    hs0 = (zeros,) * L
    cs0 = (zeros,) * L

    # ---- encoder: stacked LSTM over n_hist steps -----------------------------
    def enc_step(t, carry):
        hs, cs = carry
        off = pl.multiple_of(t * BT, BT)
        # layer 0: precomputed x-part + recurrent h-part (weights indexed from
        # the VMEM ref inside the loop, not hoisted to SSA values)
        gates0 = g0_buf[pl.ds(off, BT), :] + jnp.dot(
            hs[0].astype(bf16), whh_e_ref[0], preferred_element_type=f32
        )
        h_l, c_l = gate_act(gates0, cs[0])
        new_h, new_c = [h_l], [c_l]
        for l in range(1, L):                 # short layer loop: unrolled
            h_l, c_l = cell(h_l, hs[l], cs[l],
                            wih_e_ref[l], whh_e_ref[l], b_e_ref[l])
            new_h.append(h_l)
            new_c.append(c_l)
        return tuple(new_h), tuple(new_c)

    hs, cs = jax.lax.fori_loop(0, n_hist, enc_step, (hs0, cs0))

    # ---- decoder: autoregressive stacked LSTM over n_pred steps --------------
    def dec_stack(x_l, hs, cs):
        new_h, new_c = [], []
        for l in range(L):
            x_l, c_l = cell(x_l, hs[l], cs[l],
                            wih_d_ref[l], whh_d_ref[l], b_d_ref[l])
            new_h.append(x_l)
            new_c.append(c_l)
        return tuple(new_h), tuple(new_c)

    # step 0 peeled: decoder input is zeros (matches torch reference), so the
    # loop carry needs no separate dec_in -- later steps feed hs[L-1] directly.
    hs, cs = dec_stack(zeros, hs, cs)
    dec_buf[pl.ds(0, BT), :] = hs[L - 1]

    def dec_step(t, carry):
        hs, cs = carry
        hs, cs = dec_stack(hs[L - 1], hs, cs)
        off = pl.multiple_of(t * BT, BT)
        dec_buf[pl.ds(off, BT), :] = hs[L - 1]
        return hs, cs

    jax.lax.fori_loop(1, n_pred, dec_step, (hs, cs))

    # ---- decoder linear: one batched matmul + one lane-dense store -----------
    out_ref[0] = (
        jnp.dot(dec_buf[...].astype(bf16), wd_ref[...],
                preferred_element_type=f32)
        + bd_ref[...]
    )


# ----------------------------------------------------------------------------
# Wrapper: layout plumbing + pallas_call
# ----------------------------------------------------------------------------
def costnet_forward(inputs, params, n_pred, output_dim):
    """inputs: [B, n_hist, N, input_dim] -> [B, n_pred, N, output_dim]"""
    B, n_hist, N, input_dim = inputs.shape
    Fin = N * input_dim
    H = params["we"].shape[1]
    L = params["wih_e"].shape[0]
    Fout = params["wd"].shape[1]
    Fout_pad = _round_up(Fout, 128)       # lane-dense output block (unmasked vst)

    mxu_m, vmem_cap, n_cores = _hw_config()

    # ---- bf16 weights (MXU-native, half the VMEM/HBM bytes), f32 biases -----
    bf16 = jnp.bfloat16
    we = params["we"].astype(bf16)
    wih_e = params["wih_e"].astype(bf16)
    whh_e = params["whh_e"].astype(bf16)
    wih_d = params["wih_d"].astype(bf16)
    whh_d = params["whh_d"].astype(bf16)
    wd = jnp.pad(params["wd"], ((0, 0), (0, Fout_pad - Fout))).astype(bf16)
    be = params["be"].astype(jnp.float32)
    b_e = params["b_e"].astype(jnp.float32)
    b_d = params["b_d"].astype(jnp.float32)
    bd = jnp.pad(params["bd"], ((0, 0), (0, Fout_pad - Fout))).astype(jnp.float32)

    # ---- per-grid-step VMEM footprint (weights single-buffered, IO x2) ------
    weight_bytes = (
        _vmem_tile_bytes((Fin, H), 2)
        + _vmem_tile_bytes((1, H), 4)
        + 4 * _vmem_tile_bytes((L, H, 4 * H), 2)
        + 2 * _vmem_tile_bytes((L, 1, 4 * H), 4)
        + _vmem_tile_bytes((H, Fout_pad), 2)
        + _vmem_tile_bytes((1, Fout_pad), 4)
    )

    def tile_bytes(bt):
        io = 2 * _vmem_tile_bytes((n_hist * bt, Fin), 2)        # x block (double-buffered)
        io += 2 * _vmem_tile_bytes((n_pred * bt, Fout_pad), 4)  # out block (double-buffered)
        scr = (
            _vmem_tile_bytes((n_hist * bt, H), 4)
            + _vmem_tile_bytes((n_hist * bt, 4 * H), 4)
            + _vmem_tile_bytes((n_pred * bt, H), 4)
        )
        return weight_bytes + io + scr

    # ---- batch tile: MXU-native M, capped by batch and by the VMEM budget ----
    slack = 12 * 2**20
    B8 = _round_up(B, 8)
    BT = min(mxu_m, B8)
    if n_cores >= 2 and B8 <= BT and B8 >= 16:
        # 2-TC parts: make sure the "parallel" grid axis has >= 2 tiles
        BT = _round_up(-(-B8 // 2), 8)
    while BT > 8 and tile_bytes(BT) + slack > vmem_cap:
        BT = max(8, _round_up(BT // 2, 8))

    num_tiles = -(-B8 // BT)
    B_pad = num_tiles * BT
    vmem_limit = int(min(vmem_cap, max(16 * 2**20, tile_bytes(BT) + slack)))

    # ---- layout: [B, n_hist, N, D] -> [num_tiles, n_hist*BT, Fin] (bf16) -----
    x = jnp.transpose(inputs, (1, 0, 2, 3)).reshape(n_hist, B, Fin)
    x = jnp.pad(x.astype(bf16), ((0, 0), (0, B_pad - B), (0, 0)))
    x = (
        x.reshape(n_hist, num_tiles, BT, Fin)
        .transpose(1, 0, 2, 3)
        .reshape(num_tiles, n_hist * BT, Fin)
    )

    # grid-invariant weights/biases: whole-array VMEM operands (no per-step
    # pipelining / double-buffering of the big LSTM weight stacks)
    in_specs = [pl.BlockSpec((1, n_hist * BT, Fin), lambda i: (i, 0, 0))] + [
        pl.BlockSpec(memory_space=pltpu.MemorySpace.VMEM) for _ in range(10)
    ]
    out_specs = pl.BlockSpec((1, n_pred * BT, Fout_pad), lambda i: (i, 0, 0))

    kernel = functools.partial(
        _costnet_kernel, n_hist=n_hist, n_pred=n_pred, BT=BT, L=L, H=H
    )

    out = pl.pallas_call(
        kernel,
        out_shape=jax.ShapeDtypeStruct((num_tiles, n_pred * BT, Fout_pad), jnp.float32),
        grid=(num_tiles,),
        in_specs=in_specs,
        out_specs=out_specs,
        scratch_shapes=[
            pltpu.VMEM((n_hist * BT, H), jnp.float32),
            pltpu.VMEM((n_hist * BT, 4 * H), jnp.float32),
            pltpu.VMEM((n_pred * BT, H), jnp.float32),
        ],
        compiler_params=pltpu.CompilerParams(
            dimension_semantics=("parallel",),
            vmem_limit_bytes=vmem_limit,
        ),
    )(x, we, be, wih_e, whh_e, b_e, wih_d, whh_d, b_d, wd, bd)

    # [num_tiles, n_pred*BT, Fout_pad] -> [n_pred, B, Fout] -> [B, n_pred, N, Dout]
    out = (
        out.reshape(num_tiles, n_pred, BT, Fout_pad)
        .transpose(1, 0, 2, 3)
        .reshape(n_pred, B_pad, Fout_pad)[:, :B, :Fout]
    )
    return jnp.transpose(out, (1, 0, 2)).reshape(B, n_pred, N, output_dim)


# ----------------------------------------------------------------------------
# Deterministic parameter construction (un-fused, transposed LSTM weights)
# ----------------------------------------------------------------------------
def make_params(key, n_feat_in, n_feat_out, hidden_size, n_rnn_layers):
    H, L = hidden_size, n_rnn_layers
    s = 1.0 / math.sqrt(H)
    ks = jax.random.split(key, 12)

    def u(k, shape):
        return jax.random.uniform(k, shape, jnp.float32, minval=-s, maxval=s)

    # LSTM weights stored transposed ([in, 4H]), gate order (i, f, g, o).
    # Biases are the folded sum b_ih + b_hh (single uniform draw here; only the
    # init distribution differs slightly from PyTorch, irrelevant when loading
    # trained weights).
    return {
        # encoder_linear: nn.Linear(N*input_dim, H) (weight stored transposed)
        "we": u(ks[0], (n_feat_in, H)),
        "be": u(ks[1], (1, H)),
        # encoder LSTM (input size == hidden size)
        "wih_e": u(ks[2], (L, H, 4 * H)),
        "whh_e": u(ks[3], (L, H, 4 * H)),
        "b_e": u(ks[4], (L, 1, 4 * H)),
        # decoder LSTM
        "wih_d": u(ks[5], (L, H, 4 * H)),
        "whh_d": u(ks[6], (L, H, 4 * H)),
        "b_d": u(ks[7], (L, 1, 4 * H)),
        # decoder_linear: nn.Linear(H, N*output_dim) (weight stored transposed)
        "wd": u(ks[8], (H, n_feat_out)),
        "bd": u(ks[9], (1, n_feat_out)),
    }


if __name__ == "__main__":
    # small, module-consistent shapes
    B = 4
    n_hist = 8
    n_pred = 4
    N = 8              # node_num
    input_dim = 2
    output_dim = 2
    hidden_size = 32
    n_rnn_layers = 2

    key = jax.random.PRNGKey(0)
    k_x, k_p = jax.random.split(key)

    inputs = jax.random.normal(k_x, (B, n_hist, N, input_dim), jnp.float32)
    params = make_params(
        k_p, N * input_dim, N * output_dim, hidden_size, n_rnn_layers
    )

    out = costnet_forward(inputs, params, n_pred, output_dim)
    out = jax.block_until_ready(out)

    assert out.shape == (B, n_pred, N, output_dim), out.shape
    assert bool(jnp.all(jnp.isfinite(out)))
    print("KERNEL_OK")
</pallas_src>

<mosaic_0001>
module attributes {stable_mosaic.version = 11 : i64} {
  func.func @_costnet_kernel(%arg0: i32, %arg1: memref<1x64x16xbf16, #tpu.memory_space<vmem>>, %arg2: memref<16x32xbf16, #tpu.memory_space<vmem>>, %arg3: memref<1x32xf32, #tpu.memory_space<vmem>>, %arg4: memref<2x32x128xbf16, #tpu.memory_space<vmem>>, %arg5: memref<2x32x128xbf16, #tpu.memory_space<vmem>>, %arg6: memref<2x1x128xf32, #tpu.memory_space<vmem>>, %arg7: memref<2x32x128xbf16, #tpu.memory_space<vmem>>, %arg8: memref<2x32x128xbf16, #tpu.memory_space<vmem>>, %arg9: memref<2x1x128xf32, #tpu.memory_space<vmem>>, %arg10: memref<32x128xbf16, #tpu.memory_space<vmem>>, %arg11: memref<1x128xf32, #tpu.memory_space<vmem>>, %arg12: memref<1x32x128xf32, #tpu.memory_space<vmem>>, %arg13: memref<64x32xf32, #tpu.memory_space<vmem>>, %arg14: memref<64x128xf32, #tpu.memory_space<vmem>>, %arg15: memref<32x32xf32, #tpu.memory_space<vmem>>) attributes {dimension_semantics = [#tpu.dimension_semantics<parallel>], iteration_bounds = array<i64: 1>, scalar_prefetch = 0 : i64, scratch_operands = 3 : i64, tpu.core_type = #tpu.core_type<tc>, window_params = [{transform_indices = @transform_0, window_bounds = array<i64: 1, 64, 16>}, {pipeline_mode = #tpu.pipeline_mode<synchronous>, transform_indices = @transform_1, window_bounds = array<i64: 16, 32>}, {pipeline_mode = #tpu.pipeline_mode<synchronous>, transform_indices = @transform_2, window_bounds = array<i64: 1, 32>}, {pipeline_mode = #tpu.pipeline_mode<synchronous>, transform_indices = @transform_3, window_bounds = array<i64: 2, 32, 128>}, {pipeline_mode = #tpu.pipeline_mode<synchronous>, transform_indices = @transform_4, window_bounds = array<i64: 2, 32, 128>}, {pipeline_mode = #tpu.pipeline_mode<synchronous>, transform_indices = @transform_5, window_bounds = array<i64: 2, 1, 128>}, {pipeline_mode = #tpu.pipeline_mode<synchronous>, transform_indices = @transform_6, window_bounds = array<i64: 2, 32, 128>}, {pipeline_mode = #tpu.pipeline_mode<synchronous>, transform_indices = @transform_7, window_bounds = array<i64: 2, 32, 128>}, {pipeline_mode = #tpu.pipeline_mode<synchronous>, transform_indices = @transform_8, window_bounds = array<i64: 2, 1, 128>}, {pipeline_mode = #tpu.pipeline_mode<synchronous>, transform_indices = @transform_9, window_bounds = array<i64: 32, 128>}, {pipeline_mode = #tpu.pipeline_mode<synchronous>, transform_indices = @transform_10, window_bounds = array<i64: 1, 128>}, {transform_indices = @transform_11, window_bounds = array<i64: 1, 32, 128>}]} {
    %c0 = arith.constant 0 : index
    %c0_0 = arith.constant 0 : index
    %c0_1 = arith.constant 0 : index
    %0 = vector.load %arg1[%c0, %c0_0, %c0_1] : memref<1x64x16xbf16, #tpu.memory_space<vmem>>, vector<1x64x16xbf16>
    %1 = vector.shape_cast %0 : vector<1x64x16xbf16> to vector<64x16xbf16>
    %c0_2 = arith.constant 0 : index
    %c0_3 = arith.constant 0 : index
    %2 = vector.load %arg2[%c0_2, %c0_3] : memref<16x32xbf16, #tpu.memory_space<vmem>>, vector<16x32xbf16>
    %cst = arith.constant dense<0.000000e+00> : vector<64x32xf32>
    %3 = tpu.matmul %1, %2, %cst {dimension_numbers = #tpu.dot_dimension_numbers<[1], [0], [0], [1], [0, 0, 1, 1], [], []>} : vector<64x16xbf16>, vector<16x32xbf16>, vector<64x32xf32> -> vector<64x32xf32>
    %c0_4 = arith.constant 0 : index
    %c0_5 = arith.constant 0 : index
    %4 = vector.load %arg3[%c0_4, %c0_5] : memref<1x32xf32, #tpu.memory_space<vmem>>, vector<1x32xf32>
    %5 = vector.broadcast %4 : vector<1x32xf32> to vector<64x32xf32>
    %6 = arith.addf %3, %5 : vector<64x32xf32>
    %c0_6 = arith.constant 0 : index
    %c0_7 = arith.constant 0 : index
    %7 = vector.load %arg13[%c0_6, %c0_7] : memref<64x32xf32, #tpu.memory_space<vmem>>, vector<64x32xf32>
    tpu.vector_store %arg13[%c0_6, %c0_7], %6 {strides = array<i32>} : memref<64x32xf32, #tpu.memory_space<vmem>>, vector<64x32xf32>,
    %c0_8 = arith.constant 0 : index
    %c0_9 = arith.constant 0 : index
    %8 = vector.load %arg13[%c0_8, %c0_9] : memref<64x32xf32, #tpu.memory_space<vmem>>, vector<64x32xf32>
    %9 = arith.truncf %8 : vector<64x32xf32> to vector<64x32xbf16>
    %c0_10 = arith.constant 0 : index
    %c0_11 = arith.constant 0 : index
    %c0_12 = arith.constant 0 : index
    %10 = vector.load %arg4[%c0_10, %c0_11, %c0_12] : memref<2x32x128xbf16, #tpu.memory_space<vmem>>, vector<1x32x128xbf16>
    %11 = vector.shape_cast %10 : vector<1x32x128xbf16> to vector<32x128xbf16>
    %cst_13 = arith.constant dense<0.000000e+00> : vector<64x128xf32>
    %12 = tpu.matmul %9, %11, %cst_13 {dimension_numbers = #tpu.dot_dimension_numbers<[1], [0], [0], [1], [0, 0, 1, 1], [], []>} : vector<64x32xbf16>, vector<32x128xbf16>, vector<64x128xf32> -> vector<64x128xf32>
    %c0_14 = arith.constant 0 : index
    %c0_15 = arith.constant 0 : index
    %c0_16 = arith.constant 0 : index
    %13 = vector.load %arg6[%c0_14, %c0_15, %c0_16] : memref<2x1x128xf32, #tpu.memory_space<vmem>>, vector<1x1x128xf32>
    %14 = vector.shape_cast %13 : vector<1x1x128xf32> to vector<1x128xf32>
    %15 = vector.broadcast %14 : vector<1x128xf32> to vector<64x128xf32>
    %16 = arith.addf %12, %15 : vector<64x128xf32>
    %c0_17 = arith.constant 0 : index
    %c0_18 = arith.constant 0 : index
    %17 = vector.load %arg14[%c0_17, %c0_18] : memref<64x128xf32, #tpu.memory_space<vmem>>, vector<64x128xf32>
    tpu.vector_store %arg14[%c0_17, %c0_18], %16 {strides = array<i32>} : memref<64x128xf32, #tpu.memory_space<vmem>>, vector<64x128xf32>,
    %cst_19 = arith.constant 0.000000e+00 : f32
    %18 = vector.broadcast %cst_19 : f32 to vector<8x32xf32>
    %c0_i32 = arith.constant 0 : i32
    %c8_i32 = arith.constant 8 : i32
    %19 = arith.addi %c0_i32, %c8_i32 : i32
    %c1_i32 = arith.constant 1 : i32
    %20:4 = scf.for %arg16 = %c0_i32 to %19 step %c1_i32 iter_args(%arg17 = %18, %arg18 = %18, %arg19 = %18, %arg20 = %18) -> (vector<8x32xf32>, vector<8x32xf32>, vector<8x32xf32>, vector<8x32xf32>)  : i32 {
      %c8_i32_59 = arith.constant 8 : i32
      %90 = arith.muli %arg16, %c8_i32_59 : i32
      %91 = tpu.assume_multiple %90, 8 : i32
      %92 = arith.index_cast %91 : i32 to index
      %c0_60 = arith.constant 0 : index
      %93 = vector.load %arg14[%92, %c0_60] : memref<64x128xf32, #tpu.memory_space<vmem>>, vector<8x128xf32>
      %94 = arith.truncf %arg17 : vector<8x32xf32> to vector<8x32xbf16>
      %c0_61 = arith.constant 0 : index
      %c0_62 = arith.constant 0 : index
      %c0_63 = arith.constant 0 : index
      %95 = vector.load %arg5[%c0_61, %c0_62, %c0_63] : memref<2x32x128xbf16, #tpu.memory_space<vmem>>, vector<1x32x128xbf16>
      %96 = vector.shape_cast %95 : vector<1x32x128xbf16> to vector<32x128xbf16>
      %cst_64 = arith.constant dense<0.000000e+00> : vector<8x128xf32>
      %97 = tpu.matmul %94, %96, %cst_64 {dimension_numbers = #tpu.dot_dimension_numbers<[1], [0], [0], [1], [0, 0, 1, 1], [], []>} : vector<8x32xbf16>, vector<32x128xbf16>, vector<8x128xf32> -> vector<8x128xf32>
      %98 = arith.addf %93, %97 : vector<8x128xf32>
      %99 = arith.negf %98 : vector<8x128xf32>
      %100 = math.exp %99 : vector<8x128xf32>
      %cst_65 = arith.constant 1.000000e+00 : f32
      %101 = vector.broadcast %cst_65 : f32 to vector<8x128xf32>
      %102 = arith.addf %101, %100 : vector<8x128xf32>
      %103 = arith.divf %101, %102 : vector<8x128xf32>
      %104 = vector.extract_strided_slice %103 {offsets = [0, 0], sizes = [8, 32], strides = [1, 1]} : vector<8x128xf32> to vector<8x32xf32>
      %105 = vector.extract_strided_slice %103 {offsets = [0, 32], sizes = [8, 32], strides = [1, 1]} : vector<8x128xf32> to vector<8x32xf32>
      %106 = vector.extract_strided_slice %103 {offsets = [0, 96], sizes = [8, 32], strides = [1, 1]} : vector<8x128xf32> to vector<8x32xf32>
      %107 = vector.extract_strided_slice %98 {offsets = [0, 64], sizes = [8, 32], strides = [1, 1]} : vector<8x128xf32> to vector<8x32xf32>
      %108 = math.tanh %107 : vector<8x32xf32>
      %109 = arith.mulf %105, %arg19 : vector<8x32xf32>
      %110 = arith.mulf %104, %108 : vector<8x32xf32>
      %111 = arith.addf %109, %110 : vector<8x32xf32>
      %112 = math.tanh %111 : vector<8x32xf32>
      %113 = arith.mulf %106, %112 : vector<8x32xf32>
      %c1_66 = arith.constant 1 : index
      %c0_67 = arith.constant 0 : index
      %c0_68 = arith.constant 0 : index
      %114 = vector.load %arg4[%c1_66, %c0_67, %c0_68] : memref<2x32x128xbf16, #tpu.memory_space<vmem>>, vector<1x32x128xbf16>
      %115 = vector.shape_cast %114 : vector<1x32x128xbf16> to vector<32x128xbf16>
      %c1_69 = arith.constant 1 : index
      %c0_70 = arith.constant 0 : index
      %c0_71 = arith.constant 0 : index
      %116 = vector.load %arg5[%c1_69, %c0_70, %c0_71] : memref<2x32x128xbf16, #tpu.memory_space<vmem>>, vector<1x32x128xbf16>
      %117 = vector.shape_cast %116 : vector<1x32x128xbf16> to vector<32x128xbf16>
      %c1_72 = arith.constant 1 : index
      %c0_73 = arith.constant 0 : index
      %c0_74 = arith.constant 0 : index
      %118 = vector.load %arg6[%c1_72, %c0_73, %c0_74] : memref<2x1x128xf32, #tpu.memory_space<vmem>>, vector<1x1x128xf32>
      %119 = vector.shape_cast %118 : vector<1x1x128xf32> to vector<1x128xf32>
      %120 = arith.truncf %113 : vector<8x32xf32> to vector<8x32xbf16>
      %cst_75 = arith.constant dense<0.000000e+00> : vector<8x128xf32>
      %121 = tpu.matmul %120, %115, %cst_75 {dimension_numbers = #tpu.dot_dimension_numbers<[1], [0], [0], [1], [0, 0, 1, 1], [], []>} : vector<8x32xbf16>, vector<32x128xbf16>, vector<8x128xf32> -> vector<8x128xf32>
      %122 = arith.truncf %arg18 : vector<8x32xf32> to vector<8x32xbf16>
      %cst_76 = arith.constant dense<0.000000e+00> : vector<8x128xf32>
      %123 = tpu.matmul %122, %117, %cst_76 {dimension_numbers = #tpu.dot_dimension_numbers<[1], [0], [0], [1], [0, 0, 1, 1], [], []>} : vector<8x32xbf16>, vector<32x128xbf16>, vector<8x128xf32> -> vector<8x128xf32>
      %124 = arith.addf %121, %123 : vector<8x128xf32>
      %125 = vector.broadcast %119 : vector<1x128xf32> to vector<8x128xf32>
      %126 = arith.addf %124, %125 : vector<8x128xf32>
      %127 = arith.negf %126 : vector<8x128xf32>
      %128 = math.exp %127 : vector<8x128xf32>
      %cst_77 = arith.constant 1.000000e+00 : f32
      %129 = vector.broadcast %cst_77 : f32 to vector<8x128xf32>
      %130 = arith.addf %129, %128 : vector<8x128xf32>
      %131 = arith.divf %129, %130 : vector<8x128xf32>
      %132 = vector.extract_strided_slice %131 {offsets = [0, 0], sizes = [8, 32], strides = [1, 1]} : vector<8x128xf32> to vector<8x32xf32>
      %133 = vector.extract_strided_slice %131 {offsets = [0, 32], sizes = [8, 32], strides = [1, 1]} : vector<8x128xf32> to vector<8x32xf32>
      %134 = vector.extract_strided_slice %131 {offsets = [0, 96], sizes = [8, 32], strides = [1, 1]} : vector<8x128xf32> to vector<8x32xf32>
      %135 = vector.extract_strided_slice %126 {offsets = [0, 64], sizes = [8, 32], strides = [1, 1]} : vector<8x128xf32> to vector<8x32xf32>
      %136 = math.tanh %135 : vector<8x32xf32>
      %137 = arith.mulf %133, %arg20 : vector<8x32xf32>
      %138 = arith.mulf %132, %136 : vector<8x32xf32>
      %139 = arith.addf %137, %138 : vector<8x32xf32>
      %140 = math.tanh %139 : vector<8x32xf32>
      %141 = arith.mulf %134, %140 : vector<8x32xf32>
      scf.yield %113, %141, %111, %139 : vector<8x32xf32>, vector<8x32xf32>, vector<8x32xf32>, vector<8x32xf32>
    }
    %c8_i32_20 = arith.constant 8 : i32
    %c0_21 = arith.constant 0 : index
    %c0_22 = arith.constant 0 : index
    %c0_23 = arith.constant 0 : index
    %21 = vector.load %arg7[%c0_21, %c0_22, %c0_23] : memref<2x32x128xbf16, #tpu.memory_space<vmem>>, vector<1x32x128xbf16>
    %22 = vector.shape_cast %21 : vector<1x32x128xbf16> to vector<32x128xbf16>
    %c0_24 = arith.constant 0 : index
    %c0_25 = arith.constant 0 : index
    %c0_26 = arith.constant 0 : index
    %23 = vector.load %arg8[%c0_24, %c0_25, %c0_26] : memref<2x32x128xbf16, #tpu.memory_space<vmem>>, vector<1x32x128xbf16>
    %24 = vector.shape_cast %23 : vector<1x32x128xbf16> to vector<32x128xbf16>
    %c0_27 = arith.constant 0 : index
    %c0_28 = arith.constant 0 : index
    %c0_29 = arith.constant 0 : index
    %25 = vector.load %arg9[%c0_27, %c0_28, %c0_29] : memref<2x1x128xf32, #tpu.memory_space<vmem>>, vector<1x1x128xf32>
    %26 = vector.shape_cast %25 : vector<1x1x128xf32> to vector<1x128xf32>
    %27 = arith.truncf %18 : vector<8x32xf32> to vector<8x32xbf16>
    %cst_30 = arith.constant dense<0.000000e+00> : vector<8x128xf32>
    %28 = tpu.matmul %27, %22, %cst_30 {dimension_numbers = #tpu.dot_dimension_numbers<[1], [0], [0], [1], [0, 0, 1, 1], [], []>} : vector<8x32xbf16>, vector<32x128xbf16>, vector<8x128xf32> -> vector<8x128xf32>
    %29 = arith.truncf %20#0 : vector<8x32xf32> to vector<8x32xbf16>
    %cst_31 = arith.constant dense<0.000000e+00> : vector<8x128xf32>
    %30 = tpu.matmul %29, %24, %cst_31 {dimension_numbers = #tpu.dot_dimension_numbers<[1], [0], [0], [1], [0, 0, 1, 1], [], []>} : vector<8x32xbf16>, vector<32x128xbf16>, vector<8x128xf32> -> vector<8x128xf32>
    %31 = arith.addf %28, %30 : vector<8x128xf32>
    %32 = vector.broadcast %26 : vector<1x128xf32> to vector<8x128xf32>
    %33 = arith.addf %31, %32 : vector<8x128xf32>
    %34 = arith.negf %33 : vector<8x128xf32>
    %35 = math.exp %34 : vector<8x128xf32>
    %cst_32 = arith.constant 1.000000e+00 : f32
    %36 = vector.broadcast %cst_32 : f32 to vector<8x128xf32>
    %37 = arith.addf %36, %35 : vector<8x128xf32>
    %38 = arith.divf %36, %37 : vector<8x128xf32>
    %39 = vector.extract_strided_slice %38 {offsets = [0, 0], sizes = [8, 32], strides = [1, 1]} : vector<8x128xf32> to vector<8x32xf32>
    %40 = vector.extract_strided_slice %38 {offsets = [0, 32], sizes = [8, 32], strides = [1, 1]} : vector<8x128xf32> to vector<8x32xf32>
    %41 = vector.extract_strided_slice %38 {offsets = [0, 96], sizes = [8, 32], strides = [1, 1]} : vector<8x128xf32> to vector<8x32xf32>
    %42 = vector.extract_strided_slice %33 {offsets = [0, 64], sizes = [8, 32], strides = [1, 1]} : vector<8x128xf32> to vector<8x32xf32>
    %43 = math.tanh %42 : vector<8x32xf32>
    %44 = arith.mulf %40, %20#2 : vector<8x32xf32>
    %45 = arith.mulf %39, %43 : vector<8x32xf32>
    %46 = arith.addf %44, %45 : vector<8x32xf32>
    %47 = math.tanh %46 : vector<8x32xf32>
    %48 = arith.mulf %41, %47 : vector<8x32xf32>
    %c1 = arith.constant 1 : index
    %c0_33 = arith.constant 0 : index
    %c0_34 = arith.constant 0 : index
    %49 = vector.load %arg7[%c1, %c0_33, %c0_34] : memref<2x32x128xbf16, #tpu.memory_space<vmem>>, vector<1x32x128xbf16>
    %50 = vector.shape_cast %49 : vector<1x32x128xbf16> to vector<32x128xbf16>
    %c1_35 = arith.constant 1 : index
    %c0_36 = arith.constant 0 : index
    %c0_37 = arith.constant 0 : index
    %51 = vector.load %arg8[%c1_35, %c0_36, %c0_37] : memref<2x32x128xbf16, #tpu.memory_space<vmem>>, vector<1x32x128xbf16>
    %52 = vector.shape_cast %51 : vector<1x32x128xbf16> to vector<32x128xbf16>
    %c1_38 = arith.constant 1 : index
    %c0_39 = arith.constant 0 : index
    %c0_40 = arith.constant 0 : index
    %53 = vector.load %arg9[%c1_38, %c0_39, %c0_40] : memref<2x1x128xf32, #tpu.memory_space<vmem>>, vector<1x1x128xf32>
    %54 = vector.shape_cast %53 : vector<1x1x128xf32> to vector<1x128xf32>
    %55 = arith.truncf %48 : vector<8x32xf32> to vector<8x32xbf16>
    %cst_41 = arith.constant dense<0.000000e+00> : vector<8x128xf32>
    %56 = tpu.matmul %55, %50, %cst_41 {dimension_numbers = #tpu.dot_dimension_numbers<[1], [0], [0], [1], [0, 0, 1, 1], [], []>} : vector<8x32xbf16>, vector<32x128xbf16>, vector<8x128xf32> -> vector<8x128xf32>
    %57 = arith.truncf %20#1 : vector<8x32xf32> to vector<8x32xbf16>
    %cst_42 = arith.constant dense<0.000000e+00> : vector<8x128xf32>
    %58 = tpu.matmul %57, %52, %cst_42 {dimension_numbers = #tpu.dot_dimension_numbers<[1], [0], [0], [1], [0, 0, 1, 1], [], []>} : vector<8x32xbf16>, vector<32x128xbf16>, vector<8x128xf32> -> vector<8x128xf32>
    %59 = arith.addf %56, %58 : vector<8x128xf32>
    %60 = vector.broadcast %54 : vector<1x128xf32> to vector<8x128xf32>
    %61 = arith.addf %59, %60 : vector<8x128xf32>
    %62 = arith.negf %61 : vector<8x128xf32>
    %63 = math.exp %62 : vector<8x128xf32>
    %cst_43 = arith.constant 1.000000e+00 : f32
    %64 = vector.broadcast %cst_43 : f32 to vector<8x128xf32>
    %65 = arith.addf %64, %63 : vector<8x128xf32>
    %66 = arith.divf %64, %65 : vector<8x128xf32>
    %67 = vector.extract_strided_slice %66 {offsets = [0, 0], sizes = [8, 32], strides = [1, 1]} : vector<8x128xf32> to vector<8x32xf32>
    %68 = vector.extract_strided_slice %66 {offsets = [0, 32], sizes = [8, 32], strides = [1, 1]} : vector<8x128xf32> to vector<8x32xf32>
    %69 = vector.extract_strided_slice %66 {offsets = [0, 96], sizes = [8, 32], strides = [1, 1]} : vector<8x128xf32> to vector<8x32xf32>
    %70 = vector.extract_strided_slice %61 {offsets = [0, 64], sizes = [8, 32], strides = [1, 1]} : vector<8x128xf32> to vector<8x32xf32>
    %71 = math.tanh %70 : vector<8x32xf32>
    %72 = arith.mulf %68, %20#3 : vector<8x32xf32>
    %73 = arith.mulf %67, %71 : vector<8x32xf32>
    %74 = arith.addf %72, %73 : vector<8x32xf32>
    %75 = math.tanh %74 : vector<8x32xf32>
    %76 = arith.mulf %69, %75 : vector<8x32xf32>
    %c0_44 = arith.constant 0 : index
    %c0_45 = arith.constant 0 : index
    %77 = vector.load %arg15[%c0_44, %c0_45] : memref<32x32xf32, #tpu.memory_space<vmem>>, vector<8x32xf32>
    tpu.vector_store %arg15[%c0_44, %c0_45], %76 {strides = array<i32>} : memref<32x32xf32, #tpu.memory_space<vmem>>, vector<8x32xf32>,
    %c1_i32_46 = arith.constant 1 : i32
    %c3_i32 = arith.constant 3 : i32
    %78 = arith.addi %c1_i32_46, %c3_i32 : i32
    %c1_i32_47 = arith.constant 1 : i32
    %79:4 = scf.for %arg16 = %c1_i32_46 to %78 step %c1_i32_47 iter_args(%arg17 = %48, %arg18 = %76, %arg19 = %46, %arg20 = %74) -> (vector<8x32xf32>, vector<8x32xf32>, vector<8x32xf32>, vector<8x32xf32>)  : i32 {
      %c0_59 = arith.constant 0 : index
      %c0_60 = arith.constant 0 : index
      %c0_61 = arith.constant 0 : index
      %90 = vector.load %arg7[%c0_59, %c0_60, %c0_61] : memref<2x32x128xbf16, #tpu.memory_space<vmem>>, vector<1x32x128xbf16>
      %91 = vector.shape_cast %90 : vector<1x32x128xbf16> to vector<32x128xbf16>
      %c0_62 = arith.constant 0 : index
      %c0_63 = arith.constant 0 : index
      %c0_64 = arith.constant 0 : index
      %92 = vector.load %arg8[%c0_62, %c0_63, %c0_64] : memref<2x32x128xbf16, #tpu.memory_space<vmem>>, vector<1x32x128xbf16>
      %93 = vector.shape_cast %92 : vector<1x32x128xbf16> to vector<32x128xbf16>
      %c0_65 = arith.constant 0 : index
      %c0_66 = arith.constant 0 : index
      %c0_67 = arith.constant 0 : index
      %94 = vector.load %arg9[%c0_65, %c0_66, %c0_67] : memref<2x1x128xf32, #tpu.memory_space<vmem>>, vector<1x1x128xf32>
      %95 = vector.shape_cast %94 : vector<1x1x128xf32> to vector<1x128xf32>
      %96 = arith.truncf %arg18 : vector<8x32xf32> to vector<8x32xbf16>
      %cst_68 = arith.constant dense<0.000000e+00> : vector<8x128xf32>
      %97 = tpu.matmul %96, %91, %cst_68 {dimension_numbers = #tpu.dot_dimension_numbers<[1], [0], [0], [1], [0, 0, 1, 1], [], []>} : vector<8x32xbf16>, vector<32x128xbf16>, vector<8x128xf32> -> vector<8x128xf32>
      %98 = arith.truncf %arg17 : vector<8x32xf32> to vector<8x32xbf16>
      %cst_69 = arith.constant dense<0.000000e+00> : vector<8x128xf32>
      %99 = tpu.matmul %98, %93, %cst_69 {dimension_numbers = #tpu.dot_dimension_numbers<[1], [0], [0], [1], [0, 0, 1, 1], [], []>} : vector<8x32xbf16>, vector<32x128xbf16>, vector<8x128xf32> -> vector<8x128xf32>
      %100 = arith.addf %97, %99 : vector<8x128xf32>
      %101 = vector.broadcast %95 : vector<1x128xf32> to vector<8x128xf32>
      %102 = arith.addf %100, %101 : vector<8x128xf32>
      %103 = arith.negf %102 : vector<8x128xf32>
      %104 = math.exp %103 : vector<8x128xf32>
      %cst_70 = arith.constant 1.000000e+00 : f32
      %105 = vector.broadcast %cst_70 : f32 to vector<8x128xf32>
      %106 = arith.addf %105, %104 : vector<8x128xf32>
      %107 = arith.divf %105, %106 : vector<8x128xf32>
      %108 = vector.extract_strided_slice %107 {offsets = [0, 0], sizes = [8, 32], strides = [1, 1]} : vector<8x128xf32> to vector<8x32xf32>
      %109 = vector.extract_strided_slice %107 {offsets = [0, 32], sizes = [8, 32], strides = [1, 1]} : vector<8x128xf32> to vector<8x32xf32>
      %110 = vector.extract_strided_slice %107 {offsets = [0, 96], sizes = [8, 32], strides = [1, 1]} : vector<8x128xf32> to vector<8x32xf32>
      %111 = vector.extract_strided_slice %102 {offsets = [0, 64], sizes = [8, 32], strides = [1, 1]} : vector<8x128xf32> to vector<8x32xf32>
      %112 = math.tanh %111 : vector<8x32xf32>
      %113 = arith.mulf %109, %arg19 : vector<8x32xf32>
      %114 = arith.mulf %108, %112 : vector<8x32xf32>
      %115 = arith.addf %113, %114 : vector<8x32xf32>
      %116 = math.tanh %115 : vector<8x32xf32>
      %117 = arith.mulf %110, %116 : vector<8x32xf32>
      %c1_71 = arith.constant 1 : index
      %c0_72 = arith.constant 0 : index
      %c0_73 = arith.constant 0 : index
      %118 = vector.load %arg7[%c1_71, %c0_72, %c0_73] : memref<2x32x128xbf16, #tpu.memory_space<vmem>>, vector<1x32x128xbf16>
      %119 = vector.shape_cast %118 : vector<1x32x128xbf16> to vector<32x128xbf16>
      %c1_74 = arith.constant 1 : index
      %c0_75 = arith.constant 0 : index
      %c0_76 = arith.constant 0 : index
      %120 = vector.load %arg8[%c1_74, %c0_75, %c0_76] : memref<2x32x128xbf16, #tpu.memory_space<vmem>>, vector<1x32x128xbf16>
      %121 = vector.shape_cast %120 : vector<1x32x128xbf16> to vector<32x128xbf16>
      %c1_77 = arith.constant 1 : index
      %c0_78 = arith.constant 0 : index
      %c0_79 = arith.constant 0 : index
      %122 = vector.load %arg9[%c1_77, %c0_78, %c0_79] : memref<2x1x128xf32, #tpu.memory_space<vmem>>, vector<1x1x128xf32>
      %123 = vector.shape_cast %122 : vector<1x1x128xf32> to vector<1x128xf32>
      %124 = arith.truncf %117 : vector<8x32xf32> to vector<8x32xbf16>
      %cst_80 = arith.constant dense<0.000000e+00> : vector<8x128xf32>
      %125 = tpu.matmul %124, %119, %cst_80 {dimension_numbers = #tpu.dot_dimension_numbers<[1], [0], [0], [1], [0, 0, 1, 1], [], []>} : vector<8x32xbf16>, vector<32x128xbf16>, vector<8x128xf32> -> vector<8x128xf32>
      %126 = arith.truncf %arg18 : vector<8x32xf32> to vector<8x32xbf16>
      %cst_81 = arith.constant dense<0.000000e+00> : vector<8x128xf32>
      %127 = tpu.matmul %126, %121, %cst_81 {dimension_numbers = #tpu.dot_dimension_numbers<[1], [0], [0], [1], [0, 0, 1, 1], [], []>} : vector<8x32xbf16>, vector<32x128xbf16>, vector<8x128xf32> -> vector<8x128xf32>
      %128 = arith.addf %125, %127 : vector<8x128xf32>
      %129 = vector.broadcast %123 : vector<1x128xf32> to vector<8x128xf32>
      %130 = arith.addf %128, %129 : vector<8x128xf32>
      %131 = arith.negf %130 : vector<8x128xf32>
      %132 = math.exp %131 : vector<8x128xf32>
      %cst_82 = arith.constant 1.000000e+00 : f32
      %133 = vector.broadcast %cst_82 : f32 to vector<8x128xf32>
      %134 = arith.addf %133, %132 : vector<8x128xf32>
      %135 = arith.divf %133, %134 : vector<8x128xf32>
      %136 = vector.extract_strided_slice %135 {offsets = [0, 0], sizes = [8, 32], strides = [1, 1]} : vector<8x128xf32> to vector<8x32xf32>
      %137 = vector.extract_strided_slice %135 {offsets = [0, 32], sizes = [8, 32], strides = [1, 1]} : vector<8x128xf32> to vector<8x32xf32>
      %138 = vector.extract_strided_slice %135 {offsets = [0, 96], sizes = [8, 32], strides = [1, 1]} : vector<8x128xf32> to vector<8x32xf32>
      %139 = vector.extract_strided_slice %130 {offsets = [0, 64], sizes = [8, 32], strides = [1, 1]} : vector<8x128xf32> to vector<8x32xf32>
      %140 = math.tanh %139 : vector<8x32xf32>
      %141 = arith.mulf %137, %arg20 : vector<8x32xf32>
      %142 = arith.mulf %136, %140 : vector<8x32xf32>
      %143 = arith.addf %141, %142 : vector<8x32xf32>
      %144 = math.tanh %143 : vector<8x32xf32>
      %145 = arith.mulf %138, %144 : vector<8x32xf32>
      %c8_i32_83 = arith.constant 8 : i32
      %146 = arith.muli %arg16, %c8_i32_83 : i32
      %147 = tpu.assume_multiple %146, 8 : i32
      %148 = arith.index_cast %147 : i32 to index
      %c0_84 = arith.constant 0 : index
      %149 = vector.load %arg15[%148, %c0_84] : memref<32x32xf32, #tpu.memory_space<vmem>>, vector<8x32xf32>
      tpu.vector_store %arg15[%148, %c0_84], %145 {strides = array<i32>} : memref<32x32xf32, #tpu.memory_space<vmem>>, vector<8x32xf32>,
      scf.yield %117, %145, %115, %143 : vector<8x32xf32>, vector<8x32xf32>, vector<8x32xf32>, vector<8x32xf32>
    }
    %c3_i32_48 = arith.constant 3 : i32
    %c0_49 = arith.constant 0 : index
    %c0_50 = arith.constant 0 : index
    %80 = vector.load %arg15[%c0_49, %c0_50] : memref<32x32xf32, #tpu.memory_space<vmem>>, vector<32x32xf32>
    %81 = arith.truncf %80 : vector<32x32xf32> to vector<32x32xbf16>
    %c0_51 = arith.constant 0 : index
    %c0_52 = arith.constant 0 : index
    %82 = vector.load %arg10[%c0_51, %c0_52] : memref<32x128xbf16, #tpu.memory_space<vmem>>, vector<32x128xbf16>
    %cst_53 = arith.constant dense<0.000000e+00> : vector<32x128xf32>
    %83 = tpu.matmul %81, %82, %cst_53 {dimension_numbers = #tpu.dot_dimension_numbers<[1], [0], [0], [1], [0, 0, 1, 1], [], []>} : vector<32x32xbf16>, vector<32x128xbf16>, vector<32x128xf32> -> vector<32x128xf32>
    %c0_54 = arith.constant 0 : index
    %c0_55 = arith.constant 0 : index
    %84 = vector.load %arg11[%c0_54, %c0_55] : memref<1x128xf32, #tpu.memory_space<vmem>>, vector<1x128xf32>
    %85 = vector.broadcast %84 : vector<1x128xf32> to vector<32x128xf32>
    %86 = arith.addf %83, %85 : vector<32x128xf32>
    %c0_56 = arith.constant 0 : index
    %c0_57 = arith.constant 0 : index
    %c0_58 = arith.constant 0 : index
    %87 = vector.load %arg12[%c0_56, %c0_57, %c0_58] : memref<1x32x128xf32, #tpu.memory_space<vmem>>, vector<1x32x128xf32>
    %88 = vector.shape_cast %87 : vector<1x32x128xf32> to vector<32x128xf32>
    %89 = vector.shape_cast %86 : vector<32x128xf32> to vector<1x32x128xf32>
    tpu.vector_store %arg12[%c0_56, %c0_57, %c0_58], %89 {strides = array<i32>} : memref<1x32x128xf32, #tpu.memory_space<vmem>>, vector<1x32x128xf32>,
    return
  }
  func.func @transform_0(%arg0: i32) -> (i32, i32, i32) {
    %c0_i32 = arith.constant 0 : i32
    %c0_i32_0 = arith.constant 0 : i32
    %c0_i32_1 = arith.constant 0 : i32
    return %arg0, %c0_i32, %c0_i32_0 : i32, i32, i32
  }
  func.func @transform_1(%arg0: i32) -> (i32, i32) {
    %c0_i32 = arith.constant 0 : i32
    %c0_i32_0 = arith.constant 0 : i32
    %c0_i32_1 = arith.constant 0 : i32
    return %c0_i32, %c0_i32_0 : i32, i32
  }
  func.func @transform_2(%arg0: i32) -> (i32, i32) {
    %c0_i32 = arith.constant 0 : i32
    %c0_i32_0 = arith.constant 0 : i32
    %c0_i32_1 = arith.constant 0 : i32
    return %c0_i32, %c0_i32_0 : i32, i32
  }
  func.func @transform_3(%arg0: i32) -> (i32, i32, i32) {
    %c0_i32 = arith.constant 0 : i32
    %c0_i32_0 = arith.constant 0 : i32
    %c0_i32_1 = arith.constant 0 : i32
    %c0_i32_2 = arith.constant 0 : i32
    return %c0_i32, %c0_i32_0, %c0_i32_1 : i32, i32, i32
  }
  func.func @transform_4(%arg0: i32) -> (i32, i32, i32) {
    %c0_i32 = arith.constant 0 : i32
    %c0_i32_0 = arith.constant 0 : i32
    %c0_i32_1 = arith.constant 0 : i32
    %c0_i32_2 = arith.constant 0 : i32
    return %c0_i32, %c0_i32_0, %c0_i32_1 : i32, i32, i32
  }
  func.func @transform_5(%arg0: i32) -> (i32, i32, i32) {
    %c0_i32 = arith.constant 0 : i32
    %c0_i32_0 = arith.constant 0 : i32
    %c0_i32_1 = arith.constant 0 : i32
    %c0_i32_2 = arith.constant 0 : i32
    return %c0_i32, %c0_i32_0, %c0_i32_1 : i32, i32, i32
  }
  func.func @transform_6(%arg0: i32) -> (i32, i32, i32) {
    %c0_i32 = arith.constant 0 : i32
    %c0_i32_0 = arith.constant 0 : i32
    %c0_i32_1 = arith.constant 0 : i32
    %c0_i32_2 = arith.constant 0 : i32
    return %c0_i32, %c0_i32_0, %c0_i32_1 : i32, i32, i32
  }
  func.func @transform_7(%arg0: i32) -> (i32, i32, i32) {
    %c0_i32 = arith.constant 0 : i32
    %c0_i32_0 = arith.constant 0 : i32
    %c0_i32_1 = arith.constant 0 : i32
    %c0_i32_2 = arith.constant 0 : i32
    return %c0_i32, %c0_i32_0, %c0_i32_1 : i32, i32, i32
  }
  func.func @transform_8(%arg0: i32) -> (i32, i32, i32) {
    %c0_i32 = arith.constant 0 : i32
    %c0_i32_0 = arith.constant 0 : i32
    %c0_i32_1 = arith.constant 0 : i32
    %c0_i32_2 = arith.constant 0 : i32
    return %c0_i32, %c0_i32_0, %c0_i32_1 : i32, i32, i32
  }
  func.func @transform_9(%arg0: i32) -> (i32, i32) {
    %c0_i32 = arith.constant 0 : i32
    %c0_i32_0 = arith.constant 0 : i32
    %c0_i32_1 = arith.constant 0 : i32
    return %c0_i32, %c0_i32_0 : i32, i32
  }
  func.func @transform_10(%arg0: i32) -> (i32, i32) {
    %c0_i32 = arith.constant 0 : i32
    %c0_i32_0 = arith.constant 0 : i32
    %c0_i32_1 = arith.constant 0 : i32
    return %c0_i32, %c0_i32_0 : i32, i32
  }
  func.func @transform_11(%arg0: i32) -> (i32, i32, i32) {
    %c0_i32 = arith.constant 0 : i32
    %c0_i32_0 = arith.constant 0 : i32
    %c0_i32_1 = arith.constant 0 : i32
    return %arg0, %c0_i32, %c0_i32_0 : i32, i32, i32
  }
}

</mosaic_0001>

<bundles_post_ra>
// kernel: tpu_custom_call.1
= control target key start
LH: loop header
LB: loop body
LE: loop exit
PB: predicated region body
PF: predicated region fallthrough
CT: control target
= control target key end

     0   :  { %16 = vsyncpa [#allocation6], 0  ;;  %s2445_s0 = inlined_call_operand.vmem [shape: bf16[1,64,16], index: 0, kind: input, shape index: {}]   ;;  %s2446_s1 = inlined_call_operand.hbm [shape: bf16[16,32], index: 1, kind: input, shape index: {}]   ;;  %s2447_s2 = inlined_call_operand.hbm [shape: f32[1,32], index: 2, kind: input, shape index: {}]   ;;  %s2448_s3 = inlined_call_operand.vmem [shape: bf16[2,32,128], index: 3, kind: input, shape index: {}]   ;;  %s2449_s4 = inlined_call_operand.hbm [shape: bf16[2,32,128], index: 4, kind: input, shape index: {}]   ;;  %s2450_s5 = inlined_call_operand.vmem [shape: f32[2,1,128], index: 5, kind: input, shape index: {}]   ;;  %s2451_s6 = inlined_call_operand.hbm [shape: bf16[2,32,128], index: 6, kind: input, shape index: {}]   ;;  %s2452_s7 = inlined_call_operand.vmem [shape: bf16[2,32,128], index: 7, kind: input, shape index: {}]   ;;  %s2453_s8 = inlined_call_operand.vmem [shape: f32[2,1,128], index: 8, kind: input, shape index: {}]   ;;  %s2454_s9 = inlined_call_operand.hbm [shape: bf16[32,128], index: 9, kind: input, shape index: {}]   ;;  %s2455_s10 = inlined_call_operand.vmem [shape: f32[1,128], index: 10, kind: input, shape index: {}]   ;;  %s2456_s11 = inlined_call_operand.hbm [shape: f32[1,32,128], index: 11, kind: output, shape index: {}]  }
   0x1   :  { %17 = vsyncpa [#allocation9], 0 }
   0x2   :  { %18 = vsyncpa [#allocation12], 0 }
   0x3   :  { %19 = vsyncpa [#allocation7], 0  ;;  %s2058_s17 = smov [#allocation8]   ;;  %s1838_s21 = scalar_lea.hbm %s2447_s2, 16 }
   0x4   :  { %s40_s18 = sshll.u32 %s2058_s17, 4  ;;  %p1839_p0 = scmp.ne.s32.totalorder %s2447_s2, %s1838_s21  ;;  %s41_s18 = int_to_ptr.vmem [resolvable:$true] %s40_s18 }
   0x5   :  { %p1842_p1 = scmp.lt.u32.totalorder %s1838_s21, %s2447_s2 }
   0x7   :  { %p1844_p2 = pnand %p1842_p1, %p1839_p0 }
   0x9   :  { %1847 = shalt.err (!%p1844_p2)
}
   0xa   :  { %s1848_s26 = scalar_lea.vmem %s41_s18, 16  ;;  %s1852_s27 = scalar_lea.vmem %s41_s18, 32 }
   0xb   :  { %p1849_p3 = scmp.ne.s32.totalorder %s41_s18, %s1848_s26  ;;  %p1853_p4 = scmp.lt.s32.totalorder %s41_s18, %s41_s18 }
   0xc   :  { %p1854_p5 = scmp.lt.s32.totalorder %s1852_s27, %s1848_s26 }
   0xe   :  { %p1855_p6 = por %p1854_p5, %p1853_p4 }
  0x10   :  { %p1856_p7 = pnand %p1855_p6, %p1849_p3 }
  0x12   :  { %1859 = shalt.err (!%p1856_p7)
}
  0x13   :  { %43 = dma.hbm_to_vmem [thread:$0]  %s2447_s2, 16, %s41_s18, [#allocation9]  }
  0x14   :  { %s2059_s30 = smov [#allocation11]   ;;  %s2060_s13 = smov [#allocation5]  }
  0x15   :  { %s65_s12 = sshll.u32 %s2059_s30, 4  ;;  %s27_s14 = sshll.u32 %s2060_s13, 4  ;;  %s66_s12 = int_to_ptr.vmem [resolvable:$true] %s65_s12  ;;  %s28_s14 = int_to_ptr.vmem [resolvable:$true] %s27_s14 }
  0x16   :  { %s1860_s17 = scalar_lea.hbm %s2451_s6, 512 }
  0x17   :  { %p1861_p8 = scmp.ne.s32.totalorder %s2451_s6, %s1860_s17  ;;  %p1864_p9 = scmp.lt.u32.totalorder %s1860_s17, %s2451_s6 }
  0x19   :  { %p1866_p10 = pnand %p1864_p9, %p1861_p8 }
  0x1b   :  { %1869 = shalt.err (!%p1866_p10)
}
  0x1c   :  { %s1870_s2 = scalar_lea.vmem %s66_s12, 512  ;;  %p1875_p12 = scmp.lt.s32.totalorder %s66_s12, %s66_s12 }
  0x1d   :  { %p1871_p11 = scmp.ne.s32.totalorder %s66_s12, %s1870_s2  ;;  %p1876_p13 = scmp.lt.s32.totalorder %s1870_s2, %s1870_s2 }
  0x1f   :  { %p1877_p0 = por %p1876_p13, %p1875_p12 }
  0x21   :  { %p1878_p1 = pnand %p1877_p0, %p1871_p11 }
  0x23   :  { %1881 = shalt.err (!%p1878_p1)
}
  0x24   :  { %s2061_s18 = smov 64   ;;  %s2062_s23 = smov 4  }
  0x25   :  { %71 = dma.hbm_to_vmem [thread:$0]  %s2451_s6, 512, %s66_s12, [#allocation12], %s2061_s18, %s2061_s18, %s2062_s23  }
  0x26   :  { %s1882_s28 = scalar_lea.hbm %s2446_s1, 128 }
  0x27   :  { %p1883_p2 = scmp.ne.s32.totalorder %s2446_s1, %s1882_s28  ;;  %p1886_p3 = scmp.lt.u32.totalorder %s1882_s28, %s2446_s1 }
  0x29   :  { %p1888_p4 = pnand %p1886_p3, %p1883_p2 }
  0x2b   :  { %1891 = shalt.err (!%p1888_p4)
}
  0x2c   :  { %s1892_s16 = scalar_lea.vmem %s28_s14, 128  ;;  %p1897_p6 = scmp.lt.s32.totalorder %s28_s14, %s28_s14 }
  0x2d   :  { %p1893_p5 = scmp.ne.s32.totalorder %s28_s14, %s1892_s16  ;;  %p1898_p7 = scmp.lt.s32.totalorder %s1892_s16, %s1892_s16 }
  0x2f   :  { %p1899_p8 = por %p1898_p7, %p1897_p6 }
  0x31   :  { %p1900_p9 = pnand %p1899_p8, %p1893_p5 }
  0x33   :  { %1903 = shalt.err (!%p1900_p9)
}
  0x34   :  { %33 = dma.hbm_to_vmem [thread:$0]  %s2446_s1, 128, %s28_s14, [#allocation6], %s2061_s18, %s2061_s18, %s2062_s23  }
  0x35   :  { %s2063_s17 = smov [#allocation10]   ;;  %s2064_s20 = smov [#allocation13]  }
  0x36   :  { %s51_s19 = sshll.u32 %s2063_s17, 4  ;;  %s81_s21 = sshll.u32 %s2064_s20, 4  ;;  %s52_s19 = int_to_ptr.vmem [resolvable:$true] %s51_s19  ;;  %s82_s21 = int_to_ptr.vmem [resolvable:$true] %s81_s21 }
  0x37   :  { %s1904_s24 = scalar_lea.hbm %s2449_s4, 512 }
  0x38   :  { %p1905_p10 = scmp.ne.s32.totalorder %s2449_s4, %s1904_s24  ;;  %p1908_p11 = scmp.lt.u32.totalorder %s1904_s24, %s2449_s4 }
  0x3a   :  { %p1910_p12 = pnand %p1908_p11, %p1905_p10 }
  0x3c   :  { %1913 = shalt.err (!%p1910_p12)
}
  0x3d   :  { %s1914_s1 = scalar_lea.vmem %s52_s19, 512  ;;  %p1919_p0 = scmp.lt.s32.totalorder %s52_s19, %s52_s19 }
  0x3e   :  { %p1915_p13 = scmp.ne.s32.totalorder %s52_s19, %s1914_s1  ;;  %p1920_p1 = scmp.lt.s32.totalorder %s1914_s1, %s1914_s1 }
  0x40   :  { %p1921_p2 = por %p1920_p1, %p1919_p0 }
  0x42   :  { %p1922_p3 = pnand %p1921_p2, %p1915_p13 }
  0x44   :  { %1925 = shalt.err (!%p1922_p3)
}
  0x45   :  { %57 = dma.hbm_to_vmem [thread:$0]  %s2449_s4, 512, %s52_s19, [#allocation9], %s2061_s18, %s2061_s18, %s2062_s23  }
  0x46   :  { %s1926_s15 = scalar_lea.hbm %s2454_s9, 256 }
  0x47   :  { %p1927_p4 = scmp.ne.s32.totalorder %s2454_s9, %s1926_s15  ;;  %p1930_p5 = scmp.lt.u32.totalorder %s1926_s15, %s2454_s9 }
  0x49   :  { %p1932_p6 = pnand %p1930_p5, %p1927_p4 }
  0x4b   :  { %1935 = shalt.err (!%p1932_p6)
}
  0x4c   :  { %s1936_s20 = scalar_lea.vmem %s82_s21, 256  ;;  %p1941_p8 = scmp.lt.s32.totalorder %s82_s21, %s82_s21 }
  0x4d   :  { %p1937_p7 = scmp.ne.s32.totalorder %s82_s21, %s1936_s20  ;;  %p1942_p9 = scmp.lt.s32.totalorder %s1936_s20, %s1936_s20 }
  0x4f   :  { %p1943_p10 = por %p1942_p9, %p1941_p8 }
  0x51   :  { %p1944_p11 = pnand %p1943_p10, %p1937_p7 }
  0x53   :  { %1947 = shalt.err (!%p1944_p11)
}
  0x54   :  { %87 = dma.hbm_to_vmem [thread:$0]  %s2454_s9, 256, %s82_s21, [#allocation12], %s2061_s18, %s2061_s18, %s2062_s23  }
  0x55   :  { %2010 = dma.done.wait [#allocation6], 128  }
  0x56   :  { %2011 = vsyncadd [#allocation6], 4294967168 }
  0x57   :  { %2012 = dma.done.wait [#allocation9], 528  }
  0x58   :  { %2013 = vsyncadd [#allocation9], 4294966768 }
  0x59   :  { %2014 = dma.done.wait [#allocation12], 768  }
  0x5a   :  { %2015 = vsyncadd [#allocation12], 4294966528  ;;  %v1759_v0 = vld [vmem:[#allocation5] sm:$0xff]   ;;  %vm149_vm0 = vcmask 130048   ;;  %v1761_v2 = vld [vmem:[%s2445_s0 + $0x8] sm:$0xff]   ;;  %vm227_vm1 = vcmask 261120  }
  0x5b   :  { %v1760_v1 = vld [vmem:[%s2445_s0] sm:$0xff]   ;;  %1539 = vmatprep.subr.bf16.mxu0 %v1759_v0  ;;  %v1762_v3 = vld [vmem:[%s2445_s0 + $0x10] sm:$0xff]   ;;  %v1763_v4 = vld [vmem:[%s2445_s0 + $0x18] sm:$0xff]   ;;  %v2245_v53 = vmov 0.0   ;;  %v2247_v54 = vmov 0.0   ;;  %v2249_v55 = vmov 0.0  }
  0x5c   :  { %1540 = vmatpush3.bf16.msra.mxu0 %v1759_v0  ;;  %1541 = vmatprep.mubr.msk.bf16.mxu0 %vm149_vm0, %v1760_v1  ;;  %v1764_v5 = vld [vmem:[%s2448_s3] sm:$0xff]   ;;  %v1765_v6 = vld [vmem:[%s2448_s3 + $0x8] sm:$0xff]   ;;  %v2251_v56 = vmov 0.0   ;;  %s2253_s30 = smov 0  }
  0x5d   :  { %1549 = vmatprep.subr.bf16.mxu1 %v1764_v5  ;;  %v1409_v7 = vld [vmem:[#allocation8] ss:$0 sm:$0xff]  ;;  %v1419_v36 = vld [vmem:[%s2450_s5] ss:$0 sm:$0xff] }
  0x5e   :  { %1550 = vmatpush3.bf16.msra.mxu1 %v1764_v5 }
  0x5f   :  { %1542 = vmatmul.mubr.msk.bf16.vlgmr.msra.gmra.mrb[0].mxu0 %vm149_vm0, %v1761_v2  ;;  %1551 = vmatprep.subr.bf16.mxu1 %v1765_v6 }
  0x60   :  { %1545 = vmatprep.mubr.msk.bf16.mxu0 %vm149_vm0, %v1762_v3 }
  0x62   :  { %1552 = vmatpush3.bf16.msra.mxu1 %v1765_v6 }
  0x67   :  { %1546 = vmatmul.mubr.msk.bf16.gmra.mrb[4].mxu0 %vm149_vm0, %v1763_v4 }
 0x132   :  { %v1543_v8 = vpop.f32.mrb[0].mxu0 }
 0x133   :  { %v205_v9 = vadd.f32 %v1543_v8, %v1409_v7  ;;  %v196_v10 = vpop.f32.mrb[1].mxu0 }
 0x134   :  { %v197_v11 = vadd.f32 %v1409_v7, %v196_v10  ;;  %v1544_v12 = vpop.f32.mrb[2].mxu0 }
 0x135   :  { %230 = vst.msk [vmem:[#allocation2 + $0x10] sm:$0xff] %vm227_vm1, %v205_v9  ;;  %v208_v13 = vadd.f32 %v1544_v12, %v1409_v7  ;;  %v199_v14 = vpop.f32.mrb[3].mxu0 }
 0x136   :  { %228 = vst.msk [vmem:[#allocation2] sm:$0xff] %vm227_vm1, %v197_v11  ;;  %v200_v15 = vadd.f32 %v1409_v7, %v199_v14 }
 0x137   :  { %231 = vst.msk [vmem:[#allocation2 + $0x18] sm:$0xff] %vm227_vm1, %v208_v13 }
 0x138   :  { %229 = vst.msk [vmem:[#allocation2 + $0x8] sm:$0xff] %vm227_vm1, %v200_v15 }
 0x13a   :  { %v1547_v16 = vpop.f32.mrb[4].mxu0 }
 0x13b   :  { %v221_v17 = vadd.f32 %v1547_v16, %v1409_v7  ;;  %v212_v18 = vpop.f32.mrb[5].mxu0 }
 0x13c   :  { %v213_v19 = vadd.f32 %v1409_v7, %v212_v18  ;;  %v1548_v20 = vpop.f32.mrb[6].mxu0  ;;  %v238_v28 = vld [vmem:[#allocation2 + $0x10] sm:$0xff] }
 0x13d   :  { %234 = vst.msk [vmem:[#allocation2 + $0x30] sm:$0xff] %vm227_vm1, %v221_v17  ;;  %v224_v21 = vadd.f32 %v1548_v20, %v1409_v7  ;;  %v215_v22 = vpop.f32.mrb[7].mxu0  ;;  %v236_v25 = vld [vmem:[#allocation2] sm:$0xff] }
 0x13e   :  { %232 = vst.msk [vmem:[#allocation2 + $0x20] sm:$0xff] %vm227_vm1, %v213_v19  ;;  %v216_v23 = vadd.f32 %v1409_v7, %v215_v22  ;;  %v239_v24 = vld [vmem:[#allocation2 + $0x18] sm:$0xff] }
 0x13f   :  { %235 = vst.msk [vmem:[#allocation2 + $0x38] sm:$0xff] %vm227_vm1, %v224_v21  ;;  %v237_v26 = vld [vmem:[#allocation2 + $0x8] sm:$0xff]  ;;  %v245_v29 = vpack.c.bf16 %v239_v24, %v238_v28 }
 0x140   :  { %233 = vst.msk [vmem:[#allocation2 + $0x28] sm:$0xff] %vm227_vm1, %v216_v23  ;;  %v244_v27 = vpack.c.bf16 %v237_v26, %v236_v25 }
 0x142   :  { %1553 = vmatprep.mubr.msk.bf16.mxu1 %vm227_vm1, %v244_v27 }
 0x143   :  { %1554 = vmatmul.mubr.msk.bf16.vlgmr.msra.gmra.mrb[0].mxu1 %vm227_vm1, %v245_v29 }
 0x144   :  { %v242_v34 = vld [vmem:[#allocation2 + $0x30] sm:$0xff] }
 0x145   :  { %v240_v31 = vld [vmem:[#allocation2 + $0x20] sm:$0xff] }
 0x146   :  { %v243_v30 = vld [vmem:[#allocation2 + $0x38] sm:$0xff] }
 0x147   :  { %v241_v32 = vld [vmem:[#allocation2 + $0x28] sm:$0xff]  ;;  %v247_v35 = vpack.c.bf16 %v243_v30, %v242_v34 }
 0x148   :  { %v246_v33 = vpack.c.bf16 %v241_v32, %v240_v31 }
 0x14a   :  { %1557 = vmatprep.mubr.msk.bf16.mxu1 %vm227_vm1, %v246_v33 }
 0x14b   :  { %1558 = vmatmul.mubr.msk.bf16.gmra.mrb[4].mxu1 %vm227_vm1, %v247_v35 }
 0x216   :  { %v1555_v37 = vpop.f32.mrb[0].mxu1 }
 0x217   :  { %v326_v38 = vadd.f32 %v1555_v37, %v1419_v36  ;;  %v317_v39 = vpop.f32.mrb[1].mxu1 }
 0x218   :  { %v318_v40 = vadd.f32 %v1419_v36, %v317_v39  ;;  %v1556_v41 = vpop.f32.mrb[2].mxu1 }
 0x219   :  { %350 = vst [vmem:[#allocation3 + $0x10] sm:$0xff] %v326_v38  ;;  %v329_v42 = vadd.f32 %v1556_v41, %v1419_v36  ;;  %v320_v43 = vpop.f32.mrb[3].mxu1 }
 0x21a   :  { %348 = vst [vmem:[#allocation3] sm:$0xff] %v318_v40  ;;  %v321_v44 = vadd.f32 %v1419_v36, %v320_v43 }
 0x21b   :  { %351 = vst [vmem:[#allocation3 + $0x18] sm:$0xff] %v329_v42 }
 0x21c   :  { %349 = vst [vmem:[#allocation3 + $0x8] sm:$0xff] %v321_v44 }
 0x21e   :  { %v1559_v45 = vpop.f32.mrb[4].mxu1 }
 0x21f   :  { %v342_v46 = vadd.f32 %v1559_v45, %v1419_v36  ;;  %v333_v47 = vpop.f32.mrb[5].mxu1 }
 0x220   :  { %v334_v48 = vadd.f32 %v1419_v36, %v333_v47  ;;  %v1560_v49 = vpop.f32.mrb[6].mxu1 }
 0x221   :  { %354 = vst [vmem:[#allocation3 + $0x30] sm:$0xff] %v342_v46  ;;  %v345_v50 = vadd.f32 %v1560_v49, %v1419_v36  ;;  %v336_v51 = vpop.f32.mrb[7].mxu1 }
 0x222   :  { %352 = vst [vmem:[#allocation3 + $0x20] sm:$0xff] %v334_v48  ;;  %v337_v52 = vadd.f32 %v1419_v36, %v336_v51 }
 0x223   :  { %355 = vst [vmem:[#allocation3 + $0x38] sm:$0xff] %v345_v50 }
 0x224   :  { %353 = vst [vmem:[#allocation3 + $0x28] sm:$0xff] %v337_v52 }
 0x225 LB: > { %v2065_v57 = vmov 0.0   ;;  %v1766_v58 = vld [vmem:[#allocation10] sm:$0xff]   ;;  %v369_v59 = vpack.c.bf16 %v2032_v56, %v2032_v56  ;;  %vm2066_vm2 = vmmov 0   ;;  %v1767_v60 = vld [vmem:[#allocation10 + $0x8] sm:$0xff]   ;;  %s2067_s13 = smov 32   ;;  %s1426_s15 = sshll.u32 %s2036_s30, 3  ;;  %v470_v13 = vpack.c.bf16 %v2028_v55, %v2028_v55  ;;  %s2036_s30 = sphi %s2253_s30, %s361_s30   ;;  %v2032_v56 = vphi %v2251_v56, %v456_v56   ;;  %v2028_v55 = vphi %v2249_v55, %v2461_v55   ;;  %v2024_v54 = vphi %v2247_v54, %v2460_v54   ;;  %v2020_v53 = vphi %v2245_v53, %v2459_v53  }
 0x226   : > { %1561 = vmatprep.subr.bf16.mxu0 %v2065_v57  ;;  %1569 = vmatprep.subr.bf16.mxu1 %v2065_v57  ;;  %s367_s16 = scalar_lea.vmem [#allocation3], %s1426_s15  ;;  %s2068_s6 = smov 64   ;;  %v1768_v15 = vld [vmem:[#allocation10 + $0x10] sm:$0xff]   ;;  %v1769_v16 = vld [vmem:[%s2448_s3 + $0x10] sm:$0xff]   ;;  %v1770_v17 = vld [vmem:[#allocation10 + $0x18] sm:$0xff]  }
 0x227   : > { %1565 = vmatprep.mubr.msk.bf16.mxu0 %vm2066_vm2, %v2065_v57  ;;  %1573 = vmatprep.mubr.msk.bf16.mxu1 %vm2066_vm2, %v2065_v57  ;;  %v1771_v18 = vld [vmem:[%s2448_s3 + $0x18] sm:$0xff]   ;;  %v1442_v28 = vld [vmem:[%s2450_s5 + $0x1] ss:$0 sm:$0xff]  ;;  %s361_s30 = sadd.s32 1, %s2036_s30  }
 0x228   : > { %1562 = vmatpush3.bf16.msra.mxu0 %v1766_v58  ;;  %375 = vrot.lane.b32.xlu0 %v369_v59, %s2067_s13  ;;  %p358_p12 = scmp.ge.s32.totalorder %s361_s30, 8  }
 0x229   : > { %1563 = vmatprep.subr.bf16.mxu0 %v2065_v57  ;;  %1570 = vmatpush3.bf16.msra.mxu1 %v1768_v15  ;;  %s2069_s2 = smov (%p358_p12), 32   ;;  %v2070_v48 = vmov (%p358_p12), 0.0   ;;  %v1788_v49 = vld [vmem:[#allocation11] sm:$0xff] (%p358_p12)   ;;  %v1789_v50 = vld [vmem:[%s2452_s7] sm:$0xff] (%p358_p12)   ;;  %vm2071_vm3 = vmmov (%p358_p12), 0   ;;  %v1790_v51 = vld [vmem:[#allocation11 + $0x8] sm:$0xff] (%p358_p12)  }
 0x22a   : > { %1571 = vmatprep.subr.bf16.mxu1 %v2065_v57  ;;  %v1791_v52 = vld [vmem:[%s2452_s7 + $0x8] sm:$0xff] (%p358_p12)   ;;  %v1449_v59 = vld [vmem:[%s2453_s8] ss:$0 sm:$0xff] (%p358_p12)  ;;  %s2352_s0 = smov (%p358_p12), 1  }
 0x22b   : > { %v368_v62 = vld [vmem:[%s367_s16] sm:$0xff] }
 0x22c   : > { %1564 = vmatpush3.bf16.msra.mxu0 %v1767_v60  ;;  %v1793_v15 = vld [vmem:[#allocation11 + $0x10] sm:$0xff] (%p358_p12)  }
 0x22d   : > { %1577 = vmatprep.subr.bf16.mxu0 %v2065_v57  ;;  %1572 = vmatpush3.bf16.msra.mxu1 %v1770_v17  ;;  %v1795_v17 = vld [vmem:[#allocation11 + $0x18] sm:$0xff] (%p358_p12)  }
 0x22e   :  { %1593 = vmatprep.subr.bf16.mxu1 (%p358_p12), %v2070_v48 }
 0x29a   : > { %v376_v61 = vpop.permute.xlu0 %375 }
 0x29b   : > { %1566 = vmatmul.mubr.msk.bf16.vlgmr.msra.gmra.mrb[0].mxu0 %vm227_vm1, %v376_v61 }
 0x29c   : > { %1581 = vmatprep.mubr.msk.bf16.mxu0 %vm2066_vm2, %v2065_v57  ;;  %1578 = vmatpush3.bf16.msra.mxu0 %v1769_v16  ;;  %v1794_v16 = vld [vmem:[%s2452_s7 + $0x18] sm:$0xff] (%p358_p12)  }
 0x29d   : > { %1579 = vmatprep.subr.bf16.mxu0 %v2065_v57 }
 0x2a0   : > { %1580 = vmatpush3.bf16.msra.mxu0 %v1771_v18 }
 0x2a1   :  { %1585 = vmatprep.subr.bf16.mxu0 (%p358_p12), %v2070_v48 }
 0x36e   : > { %v426_v63 = vpop.f32.mrb[0].mxu0 }
 0x36f   : > { %v432_v0 = vadd.f32 %v426_v63, %v368_v62  ;;  %v1567_v1 = vpop.f32.mrb[1].mxu0 }
 0x370   : > { %v429_v2 = vpop.f32.mrb[2].mxu0 }
 0x371   : > { %1772 = vtanh.f32 %v432_v0  ;;  %v1568_v3 = vpop.f32.mrb[3].mxu0  ;;  %v1430_v5 = vmul.f32 -1.442695, %v432_v0 }
 0x373   : > { %1774 = vpow2.f32 %v1430_v5 }
 0x37b   : > { %v1773_v4 = vpop.eup %1772 }
 0x37c   : > { %442 = vrot.lane.b32.xlu0 %v1773_v4, %s2068_s6 }
 0x37d   : > { %v1775_v6 = vpop.eup %1774 }
 0x37e   : > { %v436_v7 = vadd.f32 1.0, %v1775_v6 }
 0x380   : > { %1776 = vrcp.f32 %v436_v7  ;;  %472 = vrot.lane.b32.xlu0 %v470_v13, %s2067_s13  ;;  %v1792_v13 = vld [vmem:[%s2452_s7 + $0x10] sm:$0xff] (%p358_p12)  }
 0x38a   : > { %v1777_v8 = vpop.eup %1776 }
 0x38b   : > { %v440_v11 = vmul.f32 %v2024_v54, %v1777_v8 }
 0x3ee   : > { %v443_v9 = vpop.permute.xlu0 %442 }
 0x3ef   : > { %v445_v10 = vmul.f32 %v1777_v8, %v443_v9 }
 0x3f1   : > { %447 = vrot.lane.b32.xlu1 %v445_v10, %s2067_s13 }
 0x3f2   : > { %v473_v20 = vpop.permute.xlu0 %472 }
 0x3f3   : > { %1574 = vmatmul.mubr.msk.bf16.vlgmr.msra.gmra.mrb[0].mxu1 %vm227_vm1, %v473_v20 }
 0x3f4   :  { %1597 = vmatprep.mubr.msk.bf16.mxu1 (%p358_p12), %vm2071_vm3, %v2070_v48  ;;  %1594 = vmatpush3.bf16.msra.mxu1 (%p358_p12), %v1788_v49 }
 0x3f5   :  { %1595 = vmatprep.subr.bf16.mxu1 (%p358_p12), %v2070_v48 }
 0x3f8   :  { %1596 = vmatpush3.bf16.msra.mxu1 (%p358_p12), %v1790_v51 }
 0x3f9   :  { %1609 = vmatprep.subr.bf16.mxu1 (%p358_p12), %v2070_v48 }
 0x463   : > { %v448_v12 = vpop.permute.xlu1 %447 }
 0x464   : > { %v2269_v54 = vadd.f32 %v448_v12, %v440_v11  }
 0x466   : > { %v2457_v14 = vmov %v2269_v54 }
 0x467   : > { %1778 = vtanh.f32 %v2457_v14  ;;  %v2460_v54 = vmov %v2457_v14 }
 0x471   : > { %v1779_v19 = vpop.eup %1778 }
 0x472   : > { %453 = vrot.lane.b32.xlu1 %v1779_v19, %s2068_s6 }
 0x4c6   : > { %v523_v24 = vpop.f32.mrb[0].mxu1 }
 0x4c7   : > { %v1575_v25 = vpop.f32.mrb[1].mxu1 }
 0x4c8   : > { %v526_v26 = vpop.f32.mrb[2].mxu1 }
 0x4c9   : > { %v1576_v27 = vpop.f32.mrb[3].mxu1 }
 0x4ca   :  { %v1462_v27 = vld [vmem:[%s2453_s8 + $0x1] ss:$0 sm:$0xff] (%p358_p12) }
 0x4e4   : > { %v454_v21 = vpop.permute.xlu1 %453 }
 0x4e5   : > { %v456_v56 = vmul.f32 %v1777_v8, %v454_v21  }
 0x4e7   : > { %v469_v22 = vpack.c.bf16 %v456_v56, %v456_v56 }
 0x4e9   : > { %530 = vrot.lane.b32.xlu1 %v469_v22, %s2067_s13 }
 0x55b   : > { %v531_v23 = vpop.permute.xlu1 %530 }
 0x55c   : > { %1582 = vmatmul.mubr.msk.bf16.vlgmr.msra.gmra.mrb[4].mxu0 %vm227_vm1, %v531_v23 }
 0x55d   :  { %1589 = vmatprep.mubr.msk.bf16.mxu0 (%p358_p12), %vm2071_vm3, %v2070_v48  ;;  %1586 = vmatpush3.bf16.msra.mxu0 (%p358_p12), %v1789_v50 }
 0x55e   :  { %1587 = vmatprep.subr.bf16.mxu0 (%p358_p12), %v2070_v48 }
 0x561   :  { %1588 = vmatpush3.bf16.msra.mxu0 (%p358_p12), %v1791_v52 }
 0x562   :  { %1601 = vmatprep.subr.bf16.mxu0 (%p358_p12), %v2070_v48 }
 0x62f   : > { %v581_v29 = vpop.f32.mrb[4].mxu0 }
 0x630   : > { %v582_v30 = vadd.f32 %v581_v29, %v523_v24  ;;  %v1583_v31 = vpop.f32.mrb[5].mxu0 }
 0x631   : > { %v584_v32 = vpop.f32.mrb[6].mxu0 }
 0x632   : > { %v593_v33 = vadd.f32 %v1442_v28, %v582_v30  ;;  %v1584_v34 = vpop.f32.mrb[7].mxu0 }
 0x634   : > { %1780 = vtanh.f32 %v593_v33  ;;  %v1443_v36 = vmul.f32 -1.442695, %v593_v33 }
 0x636   : > { %1782 = vpow2.f32 %v1443_v36 }
 0x63e   : > { %v1781_v35 = vpop.eup %1780 }
 0x63f   : > { %603 = vrot.lane.b32.xlu0 %v1781_v35, %s2068_s6 }
 0x640   : > { %v1783_v37 = vpop.eup %1782 }
 0x641   : > { %v597_v38 = vadd.f32 1.0, %v1783_v37 }
 0x643   : > { %1784 = vrcp.f32 %v597_v38 }
 0x64d   : > { %v1785_v39 = vpop.eup %1784 }
 0x64e   : > { %v601_v42 = vmul.f32 %v2020_v53, %v1785_v39 }
 0x6b1   : > { %v604_v40 = vpop.permute.xlu0 %603 }
 0x6b2   : > { %v606_v41 = vmul.f32 %v1785_v39, %v604_v40 }
 0x6b4   : > { %608 = vrot.lane.b32.xlu1 %v606_v41, %s2067_s13 }
 0x726   : > { %v609_v43 = vpop.permute.xlu1 %608 }
 0x727   : > { %v2289_v53 = vadd.f32 %v609_v43, %v601_v42  }
 0x729   : > { %v2458_v44 = vmov %v2289_v53 }
 0x72a   : > { %1786 = vtanh.f32 %v2458_v44  ;;  %v2459_v53 = vmov %v2458_v44 }
 0x72b   :  { %v2072_v53 = vmov (%p358_p12), 0  }
 0x72c   :  { %1598 = vmatmul.mubr.bf16.vlgmr.msra.gmra.mrb[0].mxu1 (%p358_p12), %v2072_v53 }
 0x72d   :  { %1613 = vmatprep.mubr.msk.bf16.mxu1 (%p358_p12), %vm2071_vm3, %v2070_v48  ;;  %1610 = vmatpush3.bf16.msra.mxu1 (%p358_p12), %v1793_v15 }
 0x72e   :  { %1611 = vmatprep.subr.bf16.mxu1 (%p358_p12), %v2070_v48 }
 0x731   :  { %1612 = vmatpush3.bf16.msra.mxu1 (%p358_p12), %v1795_v17 }
 0x734   : > { %v1787_v45 = vpop.eup %1786 }
 0x735   : > { %614 = vrot.lane.b32.xlu0 %v1787_v45, %s2068_s6 }
 0x739   :  { %629 = vrot.lane.b32.xlu0 (%p358_p12), %v469_v22, %s2069_s2 }
 0x7a4   :  { %360 = sbr.rel (!%p358_p12) target bundleno = 549 (0x225), region = 106 }
 0x7a7   : > { %v615_v46 = vpop.permute.xlu0 %614 }
 0x7a8   : > { %v617_v47 = vmul.f32 %v1785_v39, %v615_v46  }
 0x7aa   : > { %v2461_v55 = vmov %v617_v47  ;;  %v785_v11 = vpack.c.bf16 (%p358_p12), %v617_v47, %v617_v47 }
 0x7ab   :  { %v630_v54 = vpop.permute.xlu0 %629 }
 0x7ac   :  { %1590 = vmatmul.mubr.msk.bf16.vlgmr.msra.gmra.mrb[0].mxu0 %vm227_vm1, %v630_v54 }
 0x7ad   :  { %1605 = vmatprep.mubr.msk.bf16.mxu0 %vm2071_vm3, %v2070_v48  ;;  %1602 = vmatpush3.bf16.msra.mxu0 %v1792_v13 }
 0x7ae   :  { %1603 = vmatprep.subr.bf16.mxu0 %v2070_v48 }
 0x7b1   :  { %1604 = vmatpush3.bf16.msra.mxu0 %v1794_v16 }
 0x7ff   :  { %v735_v55 = vpop.f32.mrb[0].mxu1 }
 0x800   :  { %v1599_v56 = vpop.f32.mrb[1].mxu1 }
 0x801   :  { %v738_v57 = vpop.f32.mrb[2].mxu1 }
 0x802   :  { %v1600_v58 = vpop.f32.mrb[3].mxu1 }
 0x87f   :  { %v680_v60 = vpop.f32.mrb[0].mxu0 }
 0x880   :  { %v736_v61 = vadd.f32 %v735_v55, %v680_v60  ;;  %v1591_v62 = vpop.f32.mrb[1].mxu0 }
 0x881   :  { %v683_v63 = vpop.f32.mrb[2].mxu0 }
 0x882   :  { %v747_v0 = vadd.f32 %v1449_v59, %v736_v61  ;;  %v1592_v1 = vpop.f32.mrb[3].mxu0 }
 0x884   :  { %1796 = vtanh.f32 %v747_v0  ;;  %v1450_v3 = vmul.f32 -1.442695, %v747_v0 }
 0x886   :  { %1798 = vpow2.f32 %v1450_v3 }
 0x88e   :  { %v1797_v2 = vpop.eup %1796 }
 0x88f   :  { %757 = vrot.lane.b32.xlu0 %v1797_v2, %s2061_s18 }
 0x890   :  { %v1799_v4 = vpop.eup %1798 }
 0x891   :  { %v751_v5 = vadd.f32 1.0, %v1799_v4 }
 0x893   :  { %1800 = vrcp.f32 %v751_v5  ;;  %787 = vrot.lane.b32.xlu0 %v785_v11, %s2069_s2 }
 0x89d   :  { %v1801_v6 = vpop.eup %1800 }
 0x89e   :  { %v755_v9 = vmul.f32 %v1801_v6, %v2457_v14 }
 0x901   :  { %v758_v7 = vpop.permute.xlu0 %757 }
 0x902   :  { %v760_v8 = vmul.f32 %v1801_v6, %v758_v7 }
 0x904   :  { %762 = vrot.lane.b32.xlu1 %v760_v8, %s2069_s2 }
 0x905   :  { %v788_v18 = vpop.permute.xlu0 %787 }
 0x906   :  { %1606 = vmatmul.mubr.msk.bf16.vlgmr.msra.gmra.mrb[4].mxu0 %vm227_vm1, %v788_v18 }
 0x976   :  { %v763_v10 = vpop.permute.xlu1 %762 }
 0x977   :  { %v765_v12 = vadd.f32 %v763_v10, %v755_v9  }
 0x979   :  { %1802 = vtanh.f32 %v765_v12 }
 0x983   :  { %v1803_v14 = vpop.eup %1802 }
 0x984   :  { %768 = vrot.lane.b32.xlu1 %v1803_v14, %s2061_s18 }
 0x9d9   :  { %v838_v23 = vpop.f32.mrb[4].mxu0 }
 0x9da   :  { %v1607_v24 = vpop.f32.mrb[5].mxu0 }
 0x9db   :  { %v841_v25 = vpop.f32.mrb[6].mxu0 }
 0x9dc   :  { %v1608_v26 = vpop.f32.mrb[7].mxu0 }
 0x9f6   :  { %v769_v19 = vpop.permute.xlu1 %768 }
 0x9f7   :  { %v771_v20 = vmul.f32 %v1801_v6, %v769_v19  }
 0x9f9   :  { %v784_v21 = vpack.c.bf16 %v771_v20, %v771_v20 }
 0x9fb   :  { %845 = vrot.lane.b32.xlu1 %v784_v21, %s2069_s2 }
 0xa6d   :  { %v846_v22 = vpop.permute.xlu1 %845 }
 0xa6e   :  { %1614 = vmatmul.mubr.msk.bf16.vlgmr.msra.gmra.mrb[4].mxu1 %vm227_vm1, %v846_v22 }
 0xb41   :  { %v896_v28 = vpop.f32.mrb[4].mxu1 }
 0xb42   :  { %v897_v29 = vadd.f32 %v896_v28, %v838_v23  ;;  %v1615_v30 = vpop.f32.mrb[5].mxu1 }
 0xb43   :  { %v899_v31 = vpop.f32.mrb[6].mxu1 }
 0xb44   :  { %v908_v32 = vadd.f32 %v1462_v27, %v897_v29  ;;  %v1616_v33 = vpop.f32.mrb[7].mxu1 }
 0xb46   :  { %1804 = vtanh.f32 %v908_v32  ;;  %v1463_v35 = vmul.f32 -1.442695, %v908_v32 }
 0xb48   :  { %1806 = vpow2.f32 %v1463_v35 }
 0xb50   :  { %v1805_v34 = vpop.eup %1804 }
 0xb51   :  { %918 = vrot.lane.b32.xlu0 %v1805_v34, %s2061_s18 }
 0xb52   :  { %v1807_v36 = vpop.eup %1806 }
 0xb53   :  { %v912_v37 = vadd.f32 1.0, %v1807_v36 }
 0xb55   :  { %1808 = vrcp.f32 %v912_v37 }
 0xb5f   :  { %v1809_v38 = vpop.eup %1808 }
 0xb60   :  { %v916_v41 = vmul.f32 %v1809_v38, %v2458_v44 }
 0xbc3   :  { %v919_v39 = vpop.permute.xlu0 %918 }
 0xbc4   :  { %v921_v40 = vmul.f32 %v1809_v38, %v919_v39 }
 0xbc6   :  { %923 = vrot.lane.b32.xlu1 %v921_v40, %s2069_s2 }
 0xc38   :  { %v924_v42 = vpop.permute.xlu1 %923 }
 0xc39   :  { %v926_v43 = vadd.f32 %v924_v42, %v916_v41  }
 0xc3b   :  { %1810 = vtanh.f32 %v926_v43 }
 0xc45   :  { %v1811_v45 = vpop.eup %1810 }
 0xc46   :  { %929 = vrot.lane.b32.xlu0 %v1811_v45, %s2061_s18 }
 0xcb8   :  { %v930_v46 = vpop.permute.xlu0 %929 }
 0xcb9   :  { %v932_v47 = vmul.f32 %v1809_v38, %v930_v46  }
 0xcbb   :  { %934 = vrot.lane.b32.xlu1 %v932_v47, %s2069_s2 }
 0xd2d   :  { %v935_v48 = vpop.permute.xlu1 %934 }
 0xd2e   :  { %937 = vst.msk [vmem:[#allocation4] sm:$0xff] %vm227_vm1, %v935_v48 }
 0xd2f LB: > { %v2073_v44 = vmov 0.0   ;;  %v1812_v49 = vld [vmem:[%s2452_s7] sm:$0xff]   ;;  %v958_v50 = vpack.c.bf16 %v2052_v20, %v2052_v20  ;;  %v1813_v51 = vld [vmem:[%s2452_s7 + $0x8] sm:$0xff]   ;;  %vm2074_vm4 = vmmov 0   ;;  %s2075_s15 = smov 32   ;;  %v957_v53 = vpack.c.bf16 %v2048_v47, %v2048_v47  ;;  %v1815_v54 = vld [vmem:[#allocation11 + $0x8] sm:$0xff]   ;;  %s2056_s0 = sphi %s2352_s0, %s943_s0   ;;  %v2052_v20 = vphi %v771_v20, %v1105_v20   ;;  %v2048_v47 = vphi %v932_v47, %v1256_v47   ;;  %v2044_v12 = vphi %v765_v12, %v1099_v12   ;;  %v2040_v43 = vphi %v926_v43, %v1250_v43  }
 0xd30   : > { %1617 = vmatprep.subr.bf16.mxu0 %v2073_v44  ;;  %1625 = vmatprep.subr.bf16.mxu1 %v2073_v44  ;;  %v1814_v52 = vld [vmem:[#allocation11] sm:$0xff]   ;;  %v1817_v57 = vld [vmem:[%s2452_s7 + $0x18] sm:$0xff]   ;;  %v1470_v63 = vld [vmem:[%s2453_s8] ss:$0 sm:$0xff]  ;;  %s2076_s19 = smov 64   ;;  %s1485_s24 = sshll.u32 %s2056_s0, 3 }
 0xd31   : > { %1621 = vmatprep.mubr.msk.bf16.mxu0 %vm2074_vm4, %v2073_v44  ;;  %1629 = vmatprep.mubr.msk.bf16.mxu1 %vm2074_vm4, %v2073_v44  ;;  %v1816_v55 = vld [vmem:[%s2452_s7 + $0x10] sm:$0xff]   ;;  %v1818_v20 = vld [vmem:[#allocation11 + $0x10] sm:$0xff]   ;;  %v1819_v21 = vld [vmem:[#allocation11 + $0x18] sm:$0xff]   ;;  %s1262_s25 = scalar_lea.vmem [#allocation4], %s1485_s24  ;;  %s943_s0 = sadd.s32 1, %s2056_s0  }
 0xd32   : > { %1618 = vmatpush3.bf16.msra.mxu0 %v1812_v49  ;;  %960 = vrot.lane.b32.xlu0 %v958_v50, %s2075_s15  ;;  %v1483_v26 = vld [vmem:[%s2453_s8 + $0x1] ss:$0 sm:$0xff]  ;;  %p940_p13 = scmp.ge.s32.totalorder %s943_s0, 4  }
 0xd33   : > { %1619 = vmatprep.subr.bf16.mxu0 %v2073_v44  ;;  %1626 = vmatpush3.bf16.msra.mxu1 %v1814_v52  ;;  %v1836_v48 = vld [vmem:[#allocation13] sm:$0xff] (%p940_p13)   ;;  %s2077_s7 = smov (%p940_p13), [#allocation14]  }
 0xd34   : > { %1627 = vmatprep.subr.bf16.mxu1 %v2073_v44  ;;  %s1357_s8 = sshll.u32 (%p940_p13), %s2077_s7, 4  ;;  %s1358_s8 = int_to_ptr.vmem [resolvable:$true] %s1357_s8 }
 0xd35   :  { %s1948_s9 = scalar_lea.vmem (%p940_p13), %s1358_s8, 512  ;;  %p1953_p1 = scmp.lt.s32.totalorder (%p940_p13), %s1358_s8, %s1358_s8 }
 0xd36   : > { %1620 = vmatpush3.bf16.msra.mxu0 %v1813_v51  ;;  %1018 = vrot.lane.b32.xlu0 %v957_v53, %s2075_s15  ;;  %p1949_p0 = scmp.ne.s32.totalorder (%p940_p13), %s1358_s8, %s1948_s9  ;;  %p1954_p2 = scmp.lt.s32.totalorder (%p940_p13), %s1948_s9, %s1948_s9 }
 0xd37   : > { %1633 = vmatprep.subr.bf16.mxu0 %v2073_v44  ;;  %1628 = vmatpush3.bf16.msra.mxu1 %v1815_v54 }
 0xd38   : > { %1641 = vmatprep.subr.bf16.mxu1 %v2073_v44  ;;  %p1955_p3 = por (%p940_p13), %p1954_p2, %p1953_p1 }
 0xd3a   :  { %p1956_p4 = pnand (%p940_p13), %p1955_p3, %p1949_p0 }
 0xda4   : > { %v961_v56 = vpop.permute.xlu0 %960 }
 0xda5   : > { %1622 = vmatmul.mubr.msk.bf16.vlgmr.msra.gmra.mrb[0].mxu0 %vm227_vm1, %v961_v56 }
 0xda6   : > { %1634 = vmatpush3.bf16.msra.mxu0 %v1816_v55  ;;  %1637 = vmatprep.mubr.msk.bf16.mxu0 %vm2074_vm4, %v2073_v44  ;;  %v1486_v55 = vld [vmem:[%s2455_s10] ss:$0 sm:$0xff] (%p940_p13) }
 0xda7   : > { %1635 = vmatprep.subr.bf16.mxu0 %v2073_v44 }
 0xda8   : > { %v1019_v58 = vpop.permute.xlu0 %1018 }
 0xda9   : > { %1630 = vmatmul.mubr.msk.bf16.vlgmr.msra.gmra.mrb[0].mxu1 %vm227_vm1, %v1019_v58 }
 0xdaa   : > { %1636 = vmatpush3.bf16.msra.mxu0 %v1817_v57  ;;  %1645 = vmatprep.mubr.msk.bf16.mxu1 %vm2074_vm4, %v2073_v44 }
 0xdab   : > { %1642 = vmatpush3.bf16.msra.mxu1 %v1818_v20  ;;  %1649 = vmatprep.subr.bf16.mxu0 (%p940_p13), %v1836_v48 }
 0xdac   : > { %1643 = vmatprep.subr.bf16.mxu1 %v2073_v44  ;;  %v1837_v44 = vld [vmem:[#allocation13 + $0x8] sm:$0xff] (%p940_p13)  }
 0xdad   : > { %1638 = vmatmul.mubr.msk.bf16.vlgmr.msra.gmra.mrb[4].mxu0 %vm227_vm1, %v1019_v58 }
 0xdae   :  { %1650 = vmatpush3.bf16.msra.mxu0 (%p940_p13), %v1836_v48 }
 0xdaf   : > { %1644 = vmatpush3.bf16.msra.mxu1 %v1819_v21  ;;  %1651 = vmatprep.subr.bf16.mxu0 (%p940_p13), %v1837_v44 }
 0xdb2   :  { %1652 = vmatpush3.bf16.msra.mxu0 (%p940_p13), %v1837_v44 }
 0xe78   : > { %v1011_v59 = vpop.f32.mrb[0].mxu0 }
 0xe79   : > { %v1623_v60 = vpop.f32.mrb[1].mxu0 }
 0xe7a   : > { %v1014_v61 = vpop.f32.mrb[2].mxu0 }
 0xe7b   : > { %v1624_v62 = vpop.f32.mrb[3].mxu0 }
 0xe7c   : > { %v1069_v0 = vpop.f32.mrb[0].mxu1 }
 0xe7d   : > { %v1070_v1 = vadd.f32 %v1069_v0, %v1011_v59  ;;  %v1631_v2 = vpop.f32.mrb[1].mxu1 }
 0xe7e   : > { %v1072_v3 = vpop.f32.mrb[2].mxu1 }
 0xe7f   : > { %v1081_v4 = vadd.f32 %v1470_v63, %v1070_v1  ;;  %v1632_v5 = vpop.f32.mrb[3].mxu1 }
 0xe80   : > { %v1162_v6 = vpop.f32.mrb[4].mxu0 }
 0xe81   : > { %1820 = vtanh.f32 %v1081_v4  ;;  %v1639_v7 = vpop.f32.mrb[5].mxu0  ;;  %v1471_v11 = vmul.f32 -1.442695, %v1081_v4 }
 0xe82   : > { %v1165_v8 = vpop.f32.mrb[6].mxu0 }
 0xe83   : > { %v1640_v9 = vpop.f32.mrb[7].mxu0  ;;  %1822 = vpow2.f32 %v1471_v11 }
 0xe8b   : > { %v1821_v10 = vpop.eup %1820 }
 0xe8c   : > { %1091 = vrot.lane.b32.xlu1 %v1821_v10, %s2076_s19 }
 0xe8d   : > { %v1823_v13 = vpop.eup %1822 }
 0xe8e   : > { %v1085_v15 = vadd.f32 1.0, %v1823_v13 }
 0xe90   : > { %1824 = vrcp.f32 %v1085_v15 }
 0xe9a   : > { %v1825_v16 = vpop.eup %1824 }
 0xe9b   : > { %v1089_v18 = vmul.f32 %v2044_v12, %v1825_v16 }
 0xefe   : > { %v1092_v17 = vpop.permute.xlu1 %1091 }
 0xeff   : > { %v1094_v14 = vmul.f32 %v1825_v16, %v1092_v17 }
 0xf01   : > { %1096 = vrot.lane.b32.xlu1 %v1094_v14, %s2075_s15 }
 0xf73   : > { %v1097_v19 = vpop.permute.xlu1 %1096 }
 0xf74   : > { %v1099_v12 = vadd.f32 %v1097_v19, %v1089_v18  }
 0xf76   : > { %1826 = vtanh.f32 %v1099_v12 }
 0xf80   : > { %v1827_v22 = vpop.eup %1826 }
 0xf81   : > { %1102 = vrot.lane.b32.xlu0 %v1827_v22, %s2076_s19 }
 0xff3   : > { %v1103_v23 = vpop.permute.xlu0 %1102 }
 0xff4   : > { %v1105_v20 = vmul.f32 %v1825_v16, %v1103_v23  }
 0xff6   : > { %v1115_v24 = vpack.c.bf16 %v1105_v20, %v1105_v20 }
 0xff8   : > { %1169 = vrot.lane.b32.xlu1 %v1115_v24, %s2075_s15 }
0x106a   : > { %v1170_v25 = vpop.permute.xlu1 %1169 }
0x106b   : > { %1646 = vmatmul.mubr.msk.bf16.vlgmr.msra.gmra.mrb[4].mxu1 %vm227_vm1, %v1170_v25 }
0x113e   : > { %v1220_v27 = vpop.f32.mrb[4].mxu1 }
0x113f   : > { %v1221_v28 = vadd.f32 %v1220_v27, %v1162_v6  ;;  %v1647_v29 = vpop.f32.mrb[5].mxu1 }
0x1140   : > { %v1223_v30 = vpop.f32.mrb[6].mxu1 }
0x1141   : > { %v1232_v31 = vadd.f32 %v1483_v26, %v1221_v28  ;;  %v1648_v32 = vpop.f32.mrb[7].mxu1 }
0x1143   : > { %1828 = vtanh.f32 %v1232_v31  ;;  %v1484_v34 = vmul.f32 -1.442695, %v1232_v31 }
0x1145   : > { %1830 = vpow2.f32 %v1484_v34 }
0x114d   : > { %v1829_v33 = vpop.eup %1828 }
0x114e   : > { %1242 = vrot.lane.b32.xlu0 %v1829_v33, %s2076_s19 }
0x114f   : > { %v1831_v35 = vpop.eup %1830 }
0x1150   : > { %v1236_v36 = vadd.f32 1.0, %v1831_v35 }
0x1152   : > { %1832 = vrcp.f32 %v1236_v36 }
0x115c   : > { %v1833_v37 = vpop.eup %1832 }
0x115d   : > { %v1240_v40 = vmul.f32 %v2040_v43, %v1833_v37 }
0x11c0   : > { %v1243_v38 = vpop.permute.xlu0 %1242 }
0x11c1   : > { %v1245_v39 = vmul.f32 %v1833_v37, %v1243_v38 }
0x11c3   : > { %1247 = vrot.lane.b32.xlu1 %v1245_v39, %s2075_s15 }
0x1235   : > { %v1248_v41 = vpop.permute.xlu1 %1247 }
0x1236   : > { %v1250_v43 = vadd.f32 %v1248_v41, %v1240_v40  }
0x1238   : > { %1834 = vtanh.f32 %v1250_v43 }
0x1242   : > { %v1835_v42 = vpop.eup %1834 }
0x1243   : > { %1253 = vrot.lane.b32.xlu0 %v1835_v42, %s2076_s19 }
0x12b5   : > { %v1254_v45 = vpop.permute.xlu0 %1253 }
0x12b6   : > { %v1256_v47 = vmul.f32 %v1833_v37, %v1254_v45  }
0x12b8   : > { %1259 = vrot.lane.b32.xlu1 %v1256_v47, %s2075_s15 }
0x1325   :  { %942 = sbr.rel (!%p940_p13) target bundleno = 3375 (0xd2f), region = 117 }
0x132a   : > { %v1260_v46 = vpop.permute.xlu1 %1259 }
0x132b   : > { %1263 = vst.msk [vmem:[%s1262_s25] sm:$0xff] %vm227_vm1, %v1260_v46 }
0x1332   :  { %v1264_v49 = vld [vmem:[#allocation4] sm:$0xff]  ;;  %v1265_v50 = vld [vmem:[#allocation4 + $0x8] sm:$0xff]  ;;  %v1266_v52 = vld [vmem:[#allocation4 + $0x10] sm:$0xff] }
0x1333   :  { %v1268_v51 = vpack.c.bf16 %v1265_v50, %v1264_v49  ;;  %v1267_v53 = vld [vmem:[#allocation4 + $0x18] sm:$0xff] }
0x1334   :  { %v1269_v54 = vpack.c.bf16 %v1267_v53, %v1266_v52 }
0x1335   :  { %1653 = vmatprep.mubr.msk.bf16.mxu0 %vm227_vm1, %v1268_v51 }
0x1336   :  { %1654 = vmatmul.mubr.msk.bf16.vlgmr.msra.gmra.mrb[0].mxu0 %vm227_vm1, %v1269_v54 }
0x1409   :  { %v1655_v12 = vpop.f32.mrb[0].mxu0 }
0x140a   :  { %v1342_v43 = vadd.f32 %v1655_v12, %v1486_v55  ;;  %v1333_v47 = vpop.f32.mrb[1].mxu0 }
0x140b   :  { %v1334_v56 = vadd.f32 %v1486_v55, %v1333_v47  ;;  %v1656_v57 = vpop.f32.mrb[2].mxu0 }
0x140c   :  { %1350 = vst [vmem:[#allocation14 + $0x10] sm:$0xff] %v1342_v43  ;;  %v1345_v58 = vadd.f32 %v1656_v57, %v1486_v55  ;;  %v1336_v59 = vpop.f32.mrb[3].mxu0 }
0x140d   :  { %1348 = vst [vmem:[#allocation14] sm:$0xff] %v1334_v56  ;;  %v1337_v60 = vadd.f32 %v1486_v55, %v1336_v59 }
0x140e   :  { %1351 = vst [vmem:[#allocation14 + $0x18] sm:$0xff] %v1345_v58 }
0x140f   :  { %1349 = vst [vmem:[#allocation14 + $0x8] sm:$0xff] %v1337_v60 }
0x1410   :  { %1959 = shalt.err (!%p1956_p4)
}
0x1411   :  { %s1960_s21 = scalar_lea.hbm %s2456_s11, 512 }
0x1412   :  { %p1961_p5 = scmp.ne.s32.totalorder %s2456_s11, %s1960_s21  ;;  %p1964_p6 = scmp.lt.u32.totalorder %s1960_s21, %s2456_s11 }
0x1414   :  { %p1966_p7 = pnand %p1964_p6, %p1961_p5 }
0x1416   :  { %1969 = shalt.err (!%p1966_p7)
}
0x1417   :  { %s2078_s14 = smov 128   ;;  %s2079_s0 = smov 8  }
0x1418   :  { %1363 = dma.vmem_to_hbm [thread:$0]  %s1358_s8, 512, %s2456_s11, [#allocation7], %s2078_s14, %s2078_s14, %s2079_s0  }
0x1419   :  { %2016 = dma.done.wait [#allocation7], 512  }
0x141a   :  { %2017 = vsyncadd [#allocation7], 4294966784 }
0x141b   :  { %1367 = vsyncpa [#allocation6], 1 }
0x141c   :  { %1368 = vsyncpa [#allocation9], 1 }
0x141d   :  { %1369 = vsyncpa [#allocation12], 1 }
0x141e   :  { %1370 = vsyncpa [#allocation7], 1 }

</bundles_post_ra>
